<compile_context>
chip_gen: v6e
topology: v6e:2x2x1
jax: 0.10.0
libtpu: 0.0.40
codegen_flags: <defaults>
</compile_context>

<pallas_src>
import functools
import math

import jax
import jax.numpy as jnp
from jax.experimental import pallas as pl
from jax.experimental.pallas import tpu as pltpu

NEG_INF = -1e9


# ----------------------------- in-kernel helpers -----------------------------

def _layernorm(x, g, b, eps=1e-5):
    mu = jnp.mean(x, axis=-1, keepdims=True)
    xc = x - mu
    var = jnp.mean(xc * xc, axis=-1, keepdims=True)
    return xc * jax.lax.rsqrt(var + eps) * g + b


def _gelu_new(x):  # GPT-2 tanh-approx GELU
    c = math.sqrt(2.0 / math.pi)
    return 0.5 * x * (1.0 + jnp.tanh(c * (x + 0.044715 * x * x * x)))


# --------------------------- fused whole-model kernel ---------------------------

def _fused_forward_kernel(ids_ref, mask_ref, wte_ref, wpe_ref,
                          ln1_g_ref, ln1_b_ref, attn_w_ref, attn_b_ref,
                          proj_w_ref, proj_b_ref, ln2_g_ref, ln2_b_ref,
                          fc_w_ref, fc_b_ref, mlp_w_ref, mlp_b_ref,
                          lnf_g_ref, lnf_b_ref, head_w_ref, head_b_ref,
                          out_ref, *, n_layer, n_head, head_dim):
    S = ids_ref.shape[1]
    V, E = wte_ref.shape
    H, D = n_head, head_dim
    scale = 1.0 / math.sqrt(D)

    # ---- token + position embeddings: one-hot gather on the MXU (exact) -----
    ids_col = ids_ref[0]                                             # (S, 1) int32
    vocab_iota = jax.lax.broadcasted_iota(jnp.int32, (S, V), 1)
    onehot = (vocab_iota == ids_col).astype(jnp.float32)            # (S, V)
    h = jnp.dot(onehot, wte_ref[...],
                preferred_element_type=jnp.float32) + wpe_ref[...]  # (S, E) f32

    mask_add = mask_ref[0]                                           # (S, S) additive

    # ---- transformer blocks, unrolled over the stacked layer axis -----------
    for l in range(n_layer):
        # self-attention sub-block
        x = _layernorm(h, ln1_g_ref[l], ln1_b_ref[l])
        qkv = jnp.dot(x.astype(jnp.bfloat16), attn_w_ref[l],
                      preferred_element_type=jnp.float32) + attn_b_ref[l]
        q = (qkv[:, :E] * scale).astype(jnp.bfloat16)   # fold 1/sqrt(D) into q
        kv = qkv[:, E:].astype(jnp.bfloat16)            # single cast for k and v
        k, v = kv[:, :E], kv[:, E:]

        ctx_parts = []
        for hh in range(H):
            sl = slice(hh * D, (hh + 1) * D)
            # scores = q_h @ k_h^T (contract last dims, no transposed K copy)
            s = jax.lax.dot_general(q[:, sl], k[:, sl],
                                    (((1,), (1,)), ((), ())),
                                    preferred_element_type=jnp.float32)
            s = s + mask_add
            s = s - jnp.max(s, axis=-1, keepdims=True)
            p = jnp.exp(s)
            p = p / jnp.sum(p, axis=-1, keepdims=True)   # exact softmax denom
            ctx_parts.append(jnp.dot(p.astype(jnp.bfloat16), v[:, sl],
                                     preferred_element_type=jnp.float32))
        ctx = jnp.concatenate(ctx_parts, axis=-1)                       # (S, E)
        attn_out = jnp.dot(ctx.astype(jnp.bfloat16), proj_w_ref[l],
                           preferred_element_type=jnp.float32) + proj_b_ref[l]
        h = h + attn_out                                                # residual

        # MLP sub-block
        x2 = _layernorm(h, ln2_g_ref[l], ln2_b_ref[l])
        m = jnp.dot(x2.astype(jnp.bfloat16), fc_w_ref[l],
                    preferred_element_type=jnp.float32) + fc_b_ref[l]
        m = _gelu_new(m)
        m2 = jnp.dot(m.astype(jnp.bfloat16), mlp_w_ref[l],
                     preferred_element_type=jnp.float32) + mlp_b_ref[l]
        h = h + m2                                                      # residual

    # ---- final LN + tied LM head + value head (kept in f32, lane-dense 128) --
    xf = _layernorm(h, lnf_g_ref[...], lnf_b_ref[...])
    out_ref[...] = jnp.dot(xf, head_w_ref[...],
                           preferred_element_type=jnp.float32) + head_b_ref[...]


# --------------------------- model forward (wrapper) ---------------------------

def gpt2_actor_critic_forward(prepped, input_ids, attention_mask=None):
    cfg = prepped["config"]
    B, S = input_ids.shape
    E, H, V, L = cfg["n_embd"], cfg["n_head"], cfg["vocab"], cfg["n_layer"]
    D = E // H
    Np = prepped["head_w"].shape[1]

    ids = input_ids.astype(jnp.int32).reshape(B, S, 1)

    # combined additive causal + key-padding mask, (B, S, S), built once here
    causal = jnp.where(jnp.arange(S)[None, :, None] >= jnp.arange(S)[None, None, :],
                       0.0, NEG_INF)                                    # (1, S, S)
    if attention_mask is None:
        mask = jnp.broadcast_to(causal, (B, S, S))
    else:
        pad = (1.0 - attention_mask.astype(jnp.float32)) * NEG_INF      # (B, S)
        mask = causal + pad[:, None, :]

    wpe_s = jax.lax.slice_in_dim(prepped["wpe"], 0, S, axis=0)          # (S, E)

    def full(shape):
        n = len(shape)
        return pl.BlockSpec(shape, lambda b, n=n: (0,) * n)

    out = pl.pallas_call(
        functools.partial(_fused_forward_kernel,
                          n_layer=L, n_head=H, head_dim=D),
        out_shape=jax.ShapeDtypeStruct((B * S, Np), jnp.float32),
        grid=(B,),
        in_specs=[
            pl.BlockSpec((1, S, 1), lambda b: (b, 0, 0)),   # ids (one batch elem)
            pl.BlockSpec((1, S, S), lambda b: (b, 0, 0)),   # additive mask
            full(prepped["wte"].shape), full(wpe_s.shape),
            full(prepped["ln1_g"].shape), full(prepped["ln1_b"].shape),
            full(prepped["attn_w"].shape), full(prepped["attn_b"].shape),
            full(prepped["proj_w"].shape), full(prepped["proj_b"].shape),
            full(prepped["ln2_g"].shape), full(prepped["ln2_b"].shape),
            full(prepped["fc_w"].shape), full(prepped["fc_b"].shape),
            full(prepped["mlp_w"].shape), full(prepped["mlp_b"].shape),
            full(prepped["lnf_g"].shape), full(prepped["lnf_b"].shape),
            full(prepped["head_w"].shape), full(prepped["head_b"].shape),
        ],
        out_specs=pl.BlockSpec((S, Np), lambda b: (b, 0)),   # lane-dense (128)
        compiler_params=pltpu.CompilerParams(
            dimension_semantics=("parallel",)),
    )(ids, mask, prepped["wte"], wpe_s,
      prepped["ln1_g"], prepped["ln1_b"], prepped["attn_w"], prepped["attn_b"],
      prepped["proj_w"], prepped["proj_b"], prepped["ln2_g"], prepped["ln2_b"],
      prepped["fc_w"], prepped["fc_b"], prepped["mlp_w"], prepped["mlp_b"],
      prepped["lnf_g"], prepped["lnf_b"], prepped["head_w"], prepped["head_b"])

    logits = out[:, :V].reshape(B, S, V)
    values = out[:, V].reshape(B, S)
    return logits, values


# ------------------------------- parameters -------------------------------

def init_params(key, vocab=64, n_positions=16, n_embd=32, n_head=2, n_layer=2):
    keys = jax.random.split(key, 3 + n_layer)

    def w(k, shape, std=0.02):
        return jax.random.normal(k, shape, jnp.float32) * std

    params = {
        "config": dict(vocab=vocab, n_embd=n_embd, n_head=n_head, n_layer=n_layer),
        "wte": w(keys[0], (vocab, n_embd)),
        "wpe": w(keys[1], (n_positions, n_embd), 0.01),
        "lnf_g": jnp.ones((1, n_embd), jnp.float32),
        "lnf_b": jnp.zeros((1, n_embd), jnp.float32),
        "value_w": w(keys[2], (n_embd, 1)),
        "value_b": jnp.zeros((1,), jnp.float32),
        "blocks": [],
    }
    for l in range(n_layer):
        bk = jax.random.split(keys[3 + l], 4)
        params["blocks"].append(dict(
            ln1_g=jnp.ones((1, n_embd), jnp.float32),
            ln1_b=jnp.zeros((1, n_embd), jnp.float32),
            attn_w=w(bk[0], (n_embd, 3 * n_embd)),
            attn_b=jnp.zeros((3 * n_embd,), jnp.float32),
            proj_w=w(bk[1], (n_embd, n_embd)),
            proj_b=jnp.zeros((n_embd,), jnp.float32),
            ln2_g=jnp.ones((1, n_embd), jnp.float32),
            ln2_b=jnp.zeros((1, n_embd), jnp.float32),
            fc_w=w(bk[2], (n_embd, 4 * n_embd)),
            fc_b=jnp.zeros((4 * n_embd,), jnp.float32),
            mlp_proj_w=w(bk[3], (4 * n_embd, n_embd)),
            mlp_proj_b=jnp.zeros((n_embd,), jnp.float32),
        ))
    return params


def prepare_params(params):
    """One-time prep: stack per-layer weights on a leading layer axis, cast matmul
    weights to bf16, reshape biases to (1, N), and fuse the tied LM head with the
    value head into one 128-lane-padded f32 weight (lane-dense head output)."""
    cfg = dict(params["config"])
    E, V, L = cfg["n_embd"], cfg["vocab"], cfg["n_layer"]
    Np = max(128, ((V + 1 + 127) // 128) * 128)

    head_w = jnp.zeros((E, Np), jnp.float32)
    head_w = head_w.at[:, :V].set(params["wte"].T)          # tied LM head (no bias)
    head_w = head_w.at[:, V].set(params["value_w"][:, 0])   # value head column
    head_b = jnp.zeros((1, Np), jnp.float32).at[0, V].set(params["value_b"][0])

    def stack(name, reshape=None, dtype=None):
        xs = [params["blocks"][l][name] for l in range(L)]
        if reshape is not None:
            xs = [x.reshape(reshape) for x in xs]
        y = jnp.stack(xs, axis=0)
        return y.astype(dtype) if dtype is not None else y

    return dict(
        config=dict(cfg, vocab_padded=Np),
        wte=params["wte"], wpe=params["wpe"],
        ln1_g=stack("ln1_g"), ln1_b=stack("ln1_b"),
        attn_w=stack("attn_w", dtype=jnp.bfloat16),
        attn_b=stack("attn_b", reshape=(1, -1)),
        proj_w=stack("proj_w", dtype=jnp.bfloat16),
        proj_b=stack("proj_b", reshape=(1, -1)),
        ln2_g=stack("ln2_g"), ln2_b=stack("ln2_b"),
        fc_w=stack("fc_w", dtype=jnp.bfloat16),
        fc_b=stack("fc_b", reshape=(1, -1)),
        mlp_w=stack("mlp_proj_w", dtype=jnp.bfloat16),
        mlp_b=stack("mlp_proj_b", reshape=(1, -1)),
        lnf_g=params["lnf_g"], lnf_b=params["lnf_b"],
        head_w=head_w, head_b=head_b,      # kept f32 for value-head precision
    )


# ---------------------------------- main ----------------------------------

if __name__ == "__main__":
    key = jax.random.PRNGKey(0)
    pkey, ikey = jax.random.split(key)
    params = init_params(pkey)
    prepped = prepare_params(params)

    B, S, V = 2, 8, params["config"]["vocab"]
    input_ids = jax.random.randint(ikey, (B, S), 0, V, dtype=jnp.int32)
    attention_mask = jnp.ones((B, S), jnp.int32)

    fwd = jax.jit(lambda ids, m: gpt2_actor_critic_forward(prepped, ids, m))
    logits, values = fwd(input_ids, attention_mask)
    jax.block_until_ready((logits, values))

    assert logits.shape == (B, S, V), logits.shape
    assert values.shape == (B, S), values.shape
    assert bool(jnp.all(jnp.isfinite(logits))) and bool(jnp.all(jnp.isfinite(values)))
    print("KERNEL_OK")
</pallas_src>

<mosaic_0001>
module attributes {stable_mosaic.version = 11 : i64} {
  func.func @_fused_forward_kernel(%arg0: i32, %arg1: memref<1x8x1xi32, #tpu.memory_space<vmem>>, %arg2: memref<1x8x8xf32, #tpu.memory_space<vmem>>, %arg3: memref<64x32xf32, #tpu.memory_space<vmem>>, %arg4: memref<8x32xf32, #tpu.memory_space<vmem>>, %arg5: memref<2x1x32xf32, #tpu.memory_space<vmem>>, %arg6: memref<2x1x32xf32, #tpu.memory_space<vmem>>, %arg7: memref<2x32x96xbf16, #tpu.memory_space<vmem>>, %arg8: memref<2x1x96xf32, #tpu.memory_space<vmem>>, %arg9: memref<2x32x32xbf16, #tpu.memory_space<vmem>>, %arg10: memref<2x1x32xf32, #tpu.memory_space<vmem>>, %arg11: memref<2x1x32xf32, #tpu.memory_space<vmem>>, %arg12: memref<2x1x32xf32, #tpu.memory_space<vmem>>, %arg13: memref<2x32x128xbf16, #tpu.memory_space<vmem>>, %arg14: memref<2x1x128xf32, #tpu.memory_space<vmem>>, %arg15: memref<2x128x32xbf16, #tpu.memory_space<vmem>>, %arg16: memref<2x1x32xf32, #tpu.memory_space<vmem>>, %arg17: memref<1x32xf32, #tpu.memory_space<vmem>>, %arg18: memref<1x32xf32, #tpu.memory_space<vmem>>, %arg19: memref<32x128xf32, #tpu.memory_space<vmem>>, %arg20: memref<1x128xf32, #tpu.memory_space<vmem>>, %arg21: memref<8x128xf32, #tpu.memory_space<vmem>>) attributes {dimension_semantics = [#tpu.dimension_semantics<parallel>], iteration_bounds = array<i64: 2>, scalar_prefetch = 0 : i64, scratch_operands = 0 : i64, tpu.core_type = #tpu.core_type<tc>, window_params = [{transform_indices = @transform_0, window_bounds = array<i64: 1, 8, 1>}, {transform_indices = @transform_1, window_bounds = array<i64: 1, 8, 8>}, {pipeline_mode = #tpu.pipeline_mode<synchronous>, transform_indices = @transform_2, window_bounds = array<i64: 64, 32>}, {pipeline_mode = #tpu.pipeline_mode<synchronous>, transform_indices = @transform_3, window_bounds = array<i64: 8, 32>}, {pipeline_mode = #tpu.pipeline_mode<synchronous>, transform_indices = @transform_4, window_bounds = array<i64: 2, 1, 32>}, {pipeline_mode = #tpu.pipeline_mode<synchronous>, transform_indices = @transform_5, window_bounds = array<i64: 2, 1, 32>}, {pipeline_mode = #tpu.pipeline_mode<synchronous>, transform_indices = @transform_6, window_bounds = array<i64: 2, 32, 96>}, {pipeline_mode = #tpu.pipeline_mode<synchronous>, transform_indices = @transform_7, window_bounds = array<i64: 2, 1, 96>}, {pipeline_mode = #tpu.pipeline_mode<synchronous>, transform_indices = @transform_8, window_bounds = array<i64: 2, 32, 32>}, {pipeline_mode = #tpu.pipeline_mode<synchronous>, transform_indices = @transform_9, window_bounds = array<i64: 2, 1, 32>}, {pipeline_mode = #tpu.pipeline_mode<synchronous>, transform_indices = @transform_10, window_bounds = array<i64: 2, 1, 32>}, {pipeline_mode = #tpu.pipeline_mode<synchronous>, transform_indices = @transform_11, window_bounds = array<i64: 2, 1, 32>}, {pipeline_mode = #tpu.pipeline_mode<synchronous>, transform_indices = @transform_12, window_bounds = array<i64: 2, 32, 128>}, {pipeline_mode = #tpu.pipeline_mode<synchronous>, transform_indices = @transform_13, window_bounds = array<i64: 2, 1, 128>}, {pipeline_mode = #tpu.pipeline_mode<synchronous>, transform_indices = @transform_14, window_bounds = array<i64: 2, 128, 32>}, {pipeline_mode = #tpu.pipeline_mode<synchronous>, transform_indices = @transform_15, window_bounds = array<i64: 2, 1, 32>}, {pipeline_mode = #tpu.pipeline_mode<synchronous>, transform_indices = @transform_16, window_bounds = array<i64: 1, 32>}, {pipeline_mode = #tpu.pipeline_mode<synchronous>, transform_indices = @transform_17, window_bounds = array<i64: 1, 32>}, {pipeline_mode = #tpu.pipeline_mode<synchronous>, transform_indices = @transform_18, window_bounds = array<i64: 32, 128>}, {pipeline_mode = #tpu.pipeline_mode<synchronous>, transform_indices = @transform_19, window_bounds = array<i64: 1, 128>}, {transform_indices = @transform_20, window_bounds = array<i64: 8, 128>}]} {
    %c0 = arith.constant 0 : index
    %c0_0 = arith.constant 0 : index
    %c0_1 = arith.constant 0 : index
    %0 = vector.load %arg1[%c0, %c0_0, %c0_1] : memref<1x8x1xi32, #tpu.memory_space<vmem>>, vector<1x8x1xi32>
    %1 = vector.shape_cast %0 : vector<1x8x1xi32> to vector<8x1xi32>
    %2 = tpu.iota {dimensions = array<i32: 1>} : vector<8x64xi32>
    %3 = vector.broadcast %1 : vector<8x1xi32> to vector<8x64xi32>
    %4 = arith.cmpi eq, %2, %3 : vector<8x64xi32>
    %5 = arith.extui %4 : vector<8x64xi1> to vector<8x64xi32>
    %6 = arith.sitofp %5 : vector<8x64xi32> to vector<8x64xf32>
    %c0_2 = arith.constant 0 : index
    %c0_3 = arith.constant 0 : index
    %7 = vector.load %arg3[%c0_2, %c0_3] : memref<64x32xf32, #tpu.memory_space<vmem>>, vector<64x32xf32>
    %cst = arith.constant dense<0.000000e+00> : vector<8x32xf32>
    %8 = tpu.matmul %6, %7, %cst {dimension_numbers = #tpu.dot_dimension_numbers<[1], [0], [0], [1], [0, 0, 1, 1], [], []>} : vector<8x64xf32>, vector<64x32xf32>, vector<8x32xf32> -> vector<8x32xf32>
    %c0_4 = arith.constant 0 : index
    %c0_5 = arith.constant 0 : index
    %9 = vector.load %arg4[%c0_4, %c0_5] : memref<8x32xf32, #tpu.memory_space<vmem>>, vector<8x32xf32>
    %10 = arith.addf %8, %9 : vector<8x32xf32>
    %c0_6 = arith.constant 0 : index
    %c0_7 = arith.constant 0 : index
    %c0_8 = arith.constant 0 : index
    %11 = vector.load %arg2[%c0_6, %c0_7, %c0_8] : memref<1x8x8xf32, #tpu.memory_space<vmem>>, vector<1x8x8xf32>
    %12 = vector.shape_cast %11 : vector<1x8x8xf32> to vector<8x8xf32>
    %c0_9 = arith.constant 0 : index
    %c0_10 = arith.constant 0 : index
    %c0_11 = arith.constant 0 : index
    %13 = vector.load %arg5[%c0_9, %c0_10, %c0_11] : memref<2x1x32xf32, #tpu.memory_space<vmem>>, vector<1x1x32xf32>
    %14 = vector.shape_cast %13 : vector<1x1x32xf32> to vector<1x32xf32>
    %c0_12 = arith.constant 0 : index
    %c0_13 = arith.constant 0 : index
    %c0_14 = arith.constant 0 : index
    %15 = vector.load %arg6[%c0_12, %c0_13, %c0_14] : memref<2x1x32xf32, #tpu.memory_space<vmem>>, vector<1x1x32xf32>
    %16 = vector.shape_cast %15 : vector<1x1x32xf32> to vector<1x32xf32>
    %cst_15 = arith.constant dense<0.000000e+00> : vector<8xf32>
    %17 = vector.multi_reduction <add>, %10, %cst_15 [1] : vector<8x32xf32> to vector<8xf32>
    %18 = vector.shape_cast %17 : vector<8xf32> to vector<8x1xf32>
    %cst_16 = arith.constant 3.200000e+01 : f32
    %19 = vector.broadcast %cst_16 : f32 to vector<8x1xf32>
    %20 = arith.divf %18, %19 : vector<8x1xf32>
    %21 = vector.broadcast %20 : vector<8x1xf32> to vector<8x32xf32>
    %22 = arith.subf %10, %21 : vector<8x32xf32>
    %23 = arith.mulf %22, %22 : vector<8x32xf32>
    %cst_17 = arith.constant dense<0.000000e+00> : vector<8xf32>
    %24 = vector.multi_reduction <add>, %23, %cst_17 [1] : vector<8x32xf32> to vector<8xf32>
    %25 = vector.shape_cast %24 : vector<8xf32> to vector<8x1xf32>
    %cst_18 = arith.constant 3.200000e+01 : f32
    %26 = vector.broadcast %cst_18 : f32 to vector<8x1xf32>
    %27 = arith.divf %25, %26 : vector<8x1xf32>
    %cst_19 = arith.constant 9.99999974E-6 : f32
    %28 = vector.broadcast %cst_19 : f32 to vector<8x1xf32>
    %29 = arith.addf %27, %28 : vector<8x1xf32>
    %30 = math.rsqrt %29 : vector<8x1xf32>
    %31 = vector.broadcast %30 : vector<8x1xf32> to vector<8x32xf32>
    %32 = arith.mulf %22, %31 : vector<8x32xf32>
    %33 = vector.broadcast %14 : vector<1x32xf32> to vector<8x32xf32>
    %34 = arith.mulf %32, %33 : vector<8x32xf32>
    %35 = vector.broadcast %16 : vector<1x32xf32> to vector<8x32xf32>
    %36 = arith.addf %34, %35 : vector<8x32xf32>
    %37 = arith.truncf %36 : vector<8x32xf32> to vector<8x32xbf16>
    %c0_20 = arith.constant 0 : index
    %c0_21 = arith.constant 0 : index
    %c0_22 = arith.constant 0 : index
    %38 = vector.load %arg7[%c0_20, %c0_21, %c0_22] : memref<2x32x96xbf16, #tpu.memory_space<vmem>>, vector<1x32x96xbf16>
    %39 = vector.shape_cast %38 : vector<1x32x96xbf16> to vector<32x96xbf16>
    %cst_23 = arith.constant dense<0.000000e+00> : vector<8x96xf32>
    %40 = tpu.matmul %37, %39, %cst_23 {dimension_numbers = #tpu.dot_dimension_numbers<[1], [0], [0], [1], [0, 0, 1, 1], [], []>} : vector<8x32xbf16>, vector<32x96xbf16>, vector<8x96xf32> -> vector<8x96xf32>
    %c0_24 = arith.constant 0 : index
    %c0_25 = arith.constant 0 : index
    %c0_26 = arith.constant 0 : index
    %41 = vector.load %arg8[%c0_24, %c0_25, %c0_26] : memref<2x1x96xf32, #tpu.memory_space<vmem>>, vector<1x1x96xf32>
    %42 = vector.shape_cast %41 : vector<1x1x96xf32> to vector<1x96xf32>
    %43 = vector.broadcast %42 : vector<1x96xf32> to vector<8x96xf32>
    %44 = arith.addf %40, %43 : vector<8x96xf32>
    %45 = vector.extract_strided_slice %44 {offsets = [0, 0], sizes = [8, 32], strides = [1, 1]} : vector<8x96xf32> to vector<8x32xf32>
    %cst_27 = arith.constant 2.500000e-01 : f32
    %46 = vector.broadcast %cst_27 : f32 to vector<8x32xf32>
    %47 = arith.mulf %45, %46 : vector<8x32xf32>
    %48 = arith.truncf %47 : vector<8x32xf32> to vector<8x32xbf16>
    %49 = vector.extract_strided_slice %44 {offsets = [0, 32], sizes = [8, 64], strides = [1, 1]} : vector<8x96xf32> to vector<8x64xf32>
    %50 = arith.truncf %49 : vector<8x64xf32> to vector<8x64xbf16>
    %51 = vector.extract_strided_slice %50 {offsets = [0, 0], sizes = [8, 32], strides = [1, 1]} : vector<8x64xbf16> to vector<8x32xbf16>
    %52 = vector.extract_strided_slice %50 {offsets = [0, 32], sizes = [8, 32], strides = [1, 1]} : vector<8x64xbf16> to vector<8x32xbf16>
    %53 = vector.extract_strided_slice %48 {offsets = [0, 0], sizes = [8, 16], strides = [1, 1]} : vector<8x32xbf16> to vector<8x16xbf16>
    %54 = vector.extract_strided_slice %51 {offsets = [0, 0], sizes = [8, 16], strides = [1, 1]} : vector<8x32xbf16> to vector<8x16xbf16>
    %cst_28 = arith.constant dense<0.000000e+00> : vector<8x8xf32>
    %55 = tpu.matmul %53, %54, %cst_28 {dimension_numbers = #tpu.dot_dimension_numbers<[1], [1], [0], [0], [0, 0, 1, 0], [], []>} : vector<8x16xbf16>, vector<8x16xbf16>, vector<8x8xf32> -> vector<8x8xf32>
    %56 = arith.addf %55, %12 : vector<8x8xf32>
    %cst_29 = arith.constant dense<0xFF800000> : vector<8xf32>
    %57 = vector.multi_reduction <maximumf>, %56, %cst_29 [1] : vector<8x8xf32> to vector<8xf32>
    %58 = vector.shape_cast %57 : vector<8xf32> to vector<8x1xf32>
    %59 = vector.broadcast %58 : vector<8x1xf32> to vector<8x8xf32>
    %60 = arith.subf %56, %59 : vector<8x8xf32>
    %61 = math.exp %60 : vector<8x8xf32>
    %cst_30 = arith.constant dense<0.000000e+00> : vector<8xf32>
    %62 = vector.multi_reduction <add>, %61, %cst_30 [1] : vector<8x8xf32> to vector<8xf32>
    %63 = vector.shape_cast %62 : vector<8xf32> to vector<8x1xf32>
    %64 = vector.broadcast %63 : vector<8x1xf32> to vector<8x8xf32>
    %65 = arith.divf %61, %64 : vector<8x8xf32>
    %66 = arith.truncf %65 : vector<8x8xf32> to vector<8x8xbf16>
    %67 = vector.extract_strided_slice %52 {offsets = [0, 0], sizes = [8, 16], strides = [1, 1]} : vector<8x32xbf16> to vector<8x16xbf16>
    %cst_31 = arith.constant dense<0.000000e+00> : vector<8x16xf32>
    %68 = tpu.matmul %66, %67, %cst_31 {dimension_numbers = #tpu.dot_dimension_numbers<[1], [0], [0], [1], [0, 0, 1, 1], [], []>} : vector<8x8xbf16>, vector<8x16xbf16>, vector<8x16xf32> -> vector<8x16xf32>
    %69 = vector.extract_strided_slice %48 {offsets = [0, 16], sizes = [8, 16], strides = [1, 1]} : vector<8x32xbf16> to vector<8x16xbf16>
    %70 = vector.extract_strided_slice %51 {offsets = [0, 16], sizes = [8, 16], strides = [1, 1]} : vector<8x32xbf16> to vector<8x16xbf16>
    %cst_32 = arith.constant dense<0.000000e+00> : vector<8x8xf32>
    %71 = tpu.matmul %69, %70, %cst_32 {dimension_numbers = #tpu.dot_dimension_numbers<[1], [1], [0], [0], [0, 0, 1, 0], [], []>} : vector<8x16xbf16>, vector<8x16xbf16>, vector<8x8xf32> -> vector<8x8xf32>
    %72 = arith.addf %71, %12 : vector<8x8xf32>
    %cst_33 = arith.constant dense<0xFF800000> : vector<8xf32>
    %73 = vector.multi_reduction <maximumf>, %72, %cst_33 [1] : vector<8x8xf32> to vector<8xf32>
    %74 = vector.shape_cast %73 : vector<8xf32> to vector<8x1xf32>
    %75 = vector.broadcast %74 : vector<8x1xf32> to vector<8x8xf32>
    %76 = arith.subf %72, %75 : vector<8x8xf32>
    %77 = math.exp %76 : vector<8x8xf32>
    %cst_34 = arith.constant dense<0.000000e+00> : vector<8xf32>
    %78 = vector.multi_reduction <add>, %77, %cst_34 [1] : vector<8x8xf32> to vector<8xf32>
    %79 = vector.shape_cast %78 : vector<8xf32> to vector<8x1xf32>
    %80 = vector.broadcast %79 : vector<8x1xf32> to vector<8x8xf32>
    %81 = arith.divf %77, %80 : vector<8x8xf32>
    %82 = arith.truncf %81 : vector<8x8xf32> to vector<8x8xbf16>
    %83 = vector.extract_strided_slice %52 {offsets = [0, 16], sizes = [8, 16], strides = [1, 1]} : vector<8x32xbf16> to vector<8x16xbf16>
    %cst_35 = arith.constant dense<0.000000e+00> : vector<8x16xf32>
    %84 = tpu.matmul %82, %83, %cst_35 {dimension_numbers = #tpu.dot_dimension_numbers<[1], [0], [0], [1], [0, 0, 1, 1], [], []>} : vector<8x8xbf16>, vector<8x16xbf16>, vector<8x16xf32> -> vector<8x16xf32>
    %85 = tpu.concatenate %68, %84 in 1 : vector<8x16xf32>, vector<8x16xf32> -> vector<8x32xf32>
    %86 = arith.truncf %85 : vector<8x32xf32> to vector<8x32xbf16>
    %c0_36 = arith.constant 0 : index
    %c0_37 = arith.constant 0 : index
    %c0_38 = arith.constant 0 : index
    %87 = vector.load %arg9[%c0_36, %c0_37, %c0_38] : memref<2x32x32xbf16, #tpu.memory_space<vmem>>, vector<1x32x32xbf16>
    %88 = vector.shape_cast %87 : vector<1x32x32xbf16> to vector<32x32xbf16>
    %cst_39 = arith.constant dense<0.000000e+00> : vector<8x32xf32>
    %89 = tpu.matmul %86, %88, %cst_39 {dimension_numbers = #tpu.dot_dimension_numbers<[1], [0], [0], [1], [0, 0, 1, 1], [], []>} : vector<8x32xbf16>, vector<32x32xbf16>, vector<8x32xf32> -> vector<8x32xf32>
    %c0_40 = arith.constant 0 : index
    %c0_41 = arith.constant 0 : index
    %c0_42 = arith.constant 0 : index
    %90 = vector.load %arg10[%c0_40, %c0_41, %c0_42] : memref<2x1x32xf32, #tpu.memory_space<vmem>>, vector<1x1x32xf32>
    %91 = vector.shape_cast %90 : vector<1x1x32xf32> to vector<1x32xf32>
    %92 = vector.broadcast %91 : vector<1x32xf32> to vector<8x32xf32>
    %93 = arith.addf %89, %92 : vector<8x32xf32>
    %94 = arith.addf %10, %93 : vector<8x32xf32>
    %c0_43 = arith.constant 0 : index
    %c0_44 = arith.constant 0 : index
    %c0_45 = arith.constant 0 : index
    %95 = vector.load %arg11[%c0_43, %c0_44, %c0_45] : memref<2x1x32xf32, #tpu.memory_space<vmem>>, vector<1x1x32xf32>
    %96 = vector.shape_cast %95 : vector<1x1x32xf32> to vector<1x32xf32>
    %c0_46 = arith.constant 0 : index
    %c0_47 = arith.constant 0 : index
    %c0_48 = arith.constant 0 : index
    %97 = vector.load %arg12[%c0_46, %c0_47, %c0_48] : memref<2x1x32xf32, #tpu.memory_space<vmem>>, vector<1x1x32xf32>
    %98 = vector.shape_cast %97 : vector<1x1x32xf32> to vector<1x32xf32>
    %cst_49 = arith.constant dense<0.000000e+00> : vector<8xf32>
    %99 = vector.multi_reduction <add>, %94, %cst_49 [1] : vector<8x32xf32> to vector<8xf32>
    %100 = vector.shape_cast %99 : vector<8xf32> to vector<8x1xf32>
    %cst_50 = arith.constant 3.200000e+01 : f32
    %101 = vector.broadcast %cst_50 : f32 to vector<8x1xf32>
    %102 = arith.divf %100, %101 : vector<8x1xf32>
    %103 = vector.broadcast %102 : vector<8x1xf32> to vector<8x32xf32>
    %104 = arith.subf %94, %103 : vector<8x32xf32>
    %105 = arith.mulf %104, %104 : vector<8x32xf32>
    %cst_51 = arith.constant dense<0.000000e+00> : vector<8xf32>
    %106 = vector.multi_reduction <add>, %105, %cst_51 [1] : vector<8x32xf32> to vector<8xf32>
    %107 = vector.shape_cast %106 : vector<8xf32> to vector<8x1xf32>
    %cst_52 = arith.constant 3.200000e+01 : f32
    %108 = vector.broadcast %cst_52 : f32 to vector<8x1xf32>
    %109 = arith.divf %107, %108 : vector<8x1xf32>
    %cst_53 = arith.constant 9.99999974E-6 : f32
    %110 = vector.broadcast %cst_53 : f32 to vector<8x1xf32>
    %111 = arith.addf %109, %110 : vector<8x1xf32>
    %112 = math.rsqrt %111 : vector<8x1xf32>
    %113 = vector.broadcast %112 : vector<8x1xf32> to vector<8x32xf32>
    %114 = arith.mulf %104, %113 : vector<8x32xf32>
    %115 = vector.broadcast %96 : vector<1x32xf32> to vector<8x32xf32>
    %116 = arith.mulf %114, %115 : vector<8x32xf32>
    %117 = vector.broadcast %98 : vector<1x32xf32> to vector<8x32xf32>
    %118 = arith.addf %116, %117 : vector<8x32xf32>
    %119 = arith.truncf %118 : vector<8x32xf32> to vector<8x32xbf16>
    %c0_54 = arith.constant 0 : index
    %c0_55 = arith.constant 0 : index
    %c0_56 = arith.constant 0 : index
    %120 = vector.load %arg13[%c0_54, %c0_55, %c0_56] : memref<2x32x128xbf16, #tpu.memory_space<vmem>>, vector<1x32x128xbf16>
    %121 = vector.shape_cast %120 : vector<1x32x128xbf16> to vector<32x128xbf16>
    %cst_57 = arith.constant dense<0.000000e+00> : vector<8x128xf32>
    %122 = tpu.matmul %119, %121, %cst_57 {dimension_numbers = #tpu.dot_dimension_numbers<[1], [0], [0], [1], [0, 0, 1, 1], [], []>} : vector<8x32xbf16>, vector<32x128xbf16>, vector<8x128xf32> -> vector<8x128xf32>
    %c0_58 = arith.constant 0 : index
    %c0_59 = arith.constant 0 : index
    %c0_60 = arith.constant 0 : index
    %123 = vector.load %arg14[%c0_58, %c0_59, %c0_60] : memref<2x1x128xf32, #tpu.memory_space<vmem>>, vector<1x1x128xf32>
    %124 = vector.shape_cast %123 : vector<1x1x128xf32> to vector<1x128xf32>
    %125 = vector.broadcast %124 : vector<1x128xf32> to vector<8x128xf32>
    %126 = arith.addf %122, %125 : vector<8x128xf32>
    %cst_61 = arith.constant 5.000000e-01 : f32
    %127 = vector.broadcast %cst_61 : f32 to vector<8x128xf32>
    %128 = arith.mulf %127, %126 : vector<8x128xf32>
    %cst_62 = arith.constant 4.471500e-02 : f32
    %129 = vector.broadcast %cst_62 : f32 to vector<8x128xf32>
    %130 = arith.mulf %129, %126 : vector<8x128xf32>
    %131 = arith.mulf %130, %126 : vector<8x128xf32>
    %132 = arith.mulf %131, %126 : vector<8x128xf32>
    %133 = arith.addf %126, %132 : vector<8x128xf32>
    %cst_63 = arith.constant 0.797884583 : f32
    %134 = vector.broadcast %cst_63 : f32 to vector<8x128xf32>
    %135 = arith.mulf %134, %133 : vector<8x128xf32>
    %136 = math.tanh %135 : vector<8x128xf32>
    %cst_64 = arith.constant 1.000000e+00 : f32
    %137 = vector.broadcast %cst_64 : f32 to vector<8x128xf32>
    %138 = arith.addf %137, %136 : vector<8x128xf32>
    %139 = arith.mulf %128, %138 : vector<8x128xf32>
    %140 = arith.truncf %139 : vector<8x128xf32> to vector<8x128xbf16>
    %c0_65 = arith.constant 0 : index
    %c0_66 = arith.constant 0 : index
    %c0_67 = arith.constant 0 : index
    %141 = vector.load %arg15[%c0_65, %c0_66, %c0_67] : memref<2x128x32xbf16, #tpu.memory_space<vmem>>, vector<1x128x32xbf16>
    %142 = vector.shape_cast %141 : vector<1x128x32xbf16> to vector<128x32xbf16>
    %cst_68 = arith.constant dense<0.000000e+00> : vector<8x32xf32>
    %143 = tpu.matmul %140, %142, %cst_68 {dimension_numbers = #tpu.dot_dimension_numbers<[1], [0], [0], [1], [0, 0, 1, 1], [], []>} : vector<8x128xbf16>, vector<128x32xbf16>, vector<8x32xf32> -> vector<8x32xf32>
    %c0_69 = arith.constant 0 : index
    %c0_70 = arith.constant 0 : index
    %c0_71 = arith.constant 0 : index
    %144 = vector.load %arg16[%c0_69, %c0_70, %c0_71] : memref<2x1x32xf32, #tpu.memory_space<vmem>>, vector<1x1x32xf32>
    %145 = vector.shape_cast %144 : vector<1x1x32xf32> to vector<1x32xf32>
    %146 = vector.broadcast %145 : vector<1x32xf32> to vector<8x32xf32>
    %147 = arith.addf %143, %146 : vector<8x32xf32>
    %148 = arith.addf %94, %147 : vector<8x32xf32>
    %c1 = arith.constant 1 : index
    %c0_72 = arith.constant 0 : index
    %c0_73 = arith.constant 0 : index
    %149 = vector.load %arg5[%c1, %c0_72, %c0_73] : memref<2x1x32xf32, #tpu.memory_space<vmem>>, vector<1x1x32xf32>
    %150 = vector.shape_cast %149 : vector<1x1x32xf32> to vector<1x32xf32>
    %c1_74 = arith.constant 1 : index
    %c0_75 = arith.constant 0 : index
    %c0_76 = arith.constant 0 : index
    %151 = vector.load %arg6[%c1_74, %c0_75, %c0_76] : memref<2x1x32xf32, #tpu.memory_space<vmem>>, vector<1x1x32xf32>
    %152 = vector.shape_cast %151 : vector<1x1x32xf32> to vector<1x32xf32>
    %cst_77 = arith.constant dense<0.000000e+00> : vector<8xf32>
    %153 = vector.multi_reduction <add>, %148, %cst_77 [1] : vector<8x32xf32> to vector<8xf32>
    %154 = vector.shape_cast %153 : vector<8xf32> to vector<8x1xf32>
    %cst_78 = arith.constant 3.200000e+01 : f32
    %155 = vector.broadcast %cst_78 : f32 to vector<8x1xf32>
    %156 = arith.divf %154, %155 : vector<8x1xf32>
    %157 = vector.broadcast %156 : vector<8x1xf32> to vector<8x32xf32>
    %158 = arith.subf %148, %157 : vector<8x32xf32>
    %159 = arith.mulf %158, %158 : vector<8x32xf32>
    %cst_79 = arith.constant dense<0.000000e+00> : vector<8xf32>
    %160 = vector.multi_reduction <add>, %159, %cst_79 [1] : vector<8x32xf32> to vector<8xf32>
    %161 = vector.shape_cast %160 : vector<8xf32> to vector<8x1xf32>
    %cst_80 = arith.constant 3.200000e+01 : f32
    %162 = vector.broadcast %cst_80 : f32 to vector<8x1xf32>
    %163 = arith.divf %161, %162 : vector<8x1xf32>
    %cst_81 = arith.constant 9.99999974E-6 : f32
    %164 = vector.broadcast %cst_81 : f32 to vector<8x1xf32>
    %165 = arith.addf %163, %164 : vector<8x1xf32>
    %166 = math.rsqrt %165 : vector<8x1xf32>
    %167 = vector.broadcast %166 : vector<8x1xf32> to vector<8x32xf32>
    %168 = arith.mulf %158, %167 : vector<8x32xf32>
    %169 = vector.broadcast %150 : vector<1x32xf32> to vector<8x32xf32>
    %170 = arith.mulf %168, %169 : vector<8x32xf32>
    %171 = vector.broadcast %152 : vector<1x32xf32> to vector<8x32xf32>
    %172 = arith.addf %170, %171 : vector<8x32xf32>
    %173 = arith.truncf %172 : vector<8x32xf32> to vector<8x32xbf16>
    %c1_82 = arith.constant 1 : index
    %c0_83 = arith.constant 0 : index
    %c0_84 = arith.constant 0 : index
    %174 = vector.load %arg7[%c1_82, %c0_83, %c0_84] : memref<2x32x96xbf16, #tpu.memory_space<vmem>>, vector<1x32x96xbf16>
    %175 = vector.shape_cast %174 : vector<1x32x96xbf16> to vector<32x96xbf16>
    %cst_85 = arith.constant dense<0.000000e+00> : vector<8x96xf32>
    %176 = tpu.matmul %173, %175, %cst_85 {dimension_numbers = #tpu.dot_dimension_numbers<[1], [0], [0], [1], [0, 0, 1, 1], [], []>} : vector<8x32xbf16>, vector<32x96xbf16>, vector<8x96xf32> -> vector<8x96xf32>
    %c1_86 = arith.constant 1 : index
    %c0_87 = arith.constant 0 : index
    %c0_88 = arith.constant 0 : index
    %177 = vector.load %arg8[%c1_86, %c0_87, %c0_88] : memref<2x1x96xf32, #tpu.memory_space<vmem>>, vector<1x1x96xf32>
    %178 = vector.shape_cast %177 : vector<1x1x96xf32> to vector<1x96xf32>
    %179 = vector.broadcast %178 : vector<1x96xf32> to vector<8x96xf32>
    %180 = arith.addf %176, %179 : vector<8x96xf32>
    %181 = vector.extract_strided_slice %180 {offsets = [0, 0], sizes = [8, 32], strides = [1, 1]} : vector<8x96xf32> to vector<8x32xf32>
    %cst_89 = arith.constant 2.500000e-01 : f32
    %182 = vector.broadcast %cst_89 : f32 to vector<8x32xf32>
    %183 = arith.mulf %181, %182 : vector<8x32xf32>
    %184 = arith.truncf %183 : vector<8x32xf32> to vector<8x32xbf16>
    %185 = vector.extract_strided_slice %180 {offsets = [0, 32], sizes = [8, 64], strides = [1, 1]} : vector<8x96xf32> to vector<8x64xf32>
    %186 = arith.truncf %185 : vector<8x64xf32> to vector<8x64xbf16>
    %187 = vector.extract_strided_slice %186 {offsets = [0, 0], sizes = [8, 32], strides = [1, 1]} : vector<8x64xbf16> to vector<8x32xbf16>
    %188 = vector.extract_strided_slice %186 {offsets = [0, 32], sizes = [8, 32], strides = [1, 1]} : vector<8x64xbf16> to vector<8x32xbf16>
    %189 = vector.extract_strided_slice %184 {offsets = [0, 0], sizes = [8, 16], strides = [1, 1]} : vector<8x32xbf16> to vector<8x16xbf16>
    %190 = vector.extract_strided_slice %187 {offsets = [0, 0], sizes = [8, 16], strides = [1, 1]} : vector<8x32xbf16> to vector<8x16xbf16>
    %cst_90 = arith.constant dense<0.000000e+00> : vector<8x8xf32>
    %191 = tpu.matmul %189, %190, %cst_90 {dimension_numbers = #tpu.dot_dimension_numbers<[1], [1], [0], [0], [0, 0, 1, 0], [], []>} : vector<8x16xbf16>, vector<8x16xbf16>, vector<8x8xf32> -> vector<8x8xf32>
    %192 = arith.addf %191, %12 : vector<8x8xf32>
    %cst_91 = arith.constant dense<0xFF800000> : vector<8xf32>
    %193 = vector.multi_reduction <maximumf>, %192, %cst_91 [1] : vector<8x8xf32> to vector<8xf32>
    %194 = vector.shape_cast %193 : vector<8xf32> to vector<8x1xf32>
    %195 = vector.broadcast %194 : vector<8x1xf32> to vector<8x8xf32>
    %196 = arith.subf %192, %195 : vector<8x8xf32>
    %197 = math.exp %196 : vector<8x8xf32>
    %cst_92 = arith.constant dense<0.000000e+00> : vector<8xf32>
    %198 = vector.multi_reduction <add>, %197, %cst_92 [1] : vector<8x8xf32> to vector<8xf32>
    %199 = vector.shape_cast %198 : vector<8xf32> to vector<8x1xf32>
    %200 = vector.broadcast %199 : vector<8x1xf32> to vector<8x8xf32>
    %201 = arith.divf %197, %200 : vector<8x8xf32>
    %202 = arith.truncf %201 : vector<8x8xf32> to vector<8x8xbf16>
    %203 = vector.extract_strided_slice %188 {offsets = [0, 0], sizes = [8, 16], strides = [1, 1]} : vector<8x32xbf16> to vector<8x16xbf16>
    %cst_93 = arith.constant dense<0.000000e+00> : vector<8x16xf32>
    %204 = tpu.matmul %202, %203, %cst_93 {dimension_numbers = #tpu.dot_dimension_numbers<[1], [0], [0], [1], [0, 0, 1, 1], [], []>} : vector<8x8xbf16>, vector<8x16xbf16>, vector<8x16xf32> -> vector<8x16xf32>
    %205 = vector.extract_strided_slice %184 {offsets = [0, 16], sizes = [8, 16], strides = [1, 1]} : vector<8x32xbf16> to vector<8x16xbf16>
    %206 = vector.extract_strided_slice %187 {offsets = [0, 16], sizes = [8, 16], strides = [1, 1]} : vector<8x32xbf16> to vector<8x16xbf16>
    %cst_94 = arith.constant dense<0.000000e+00> : vector<8x8xf32>
    %207 = tpu.matmul %205, %206, %cst_94 {dimension_numbers = #tpu.dot_dimension_numbers<[1], [1], [0], [0], [0, 0, 1, 0], [], []>} : vector<8x16xbf16>, vector<8x16xbf16>, vector<8x8xf32> -> vector<8x8xf32>
    %208 = arith.addf %207, %12 : vector<8x8xf32>
    %cst_95 = arith.constant dense<0xFF800000> : vector<8xf32>
    %209 = vector.multi_reduction <maximumf>, %208, %cst_95 [1] : vector<8x8xf32> to vector<8xf32>
    %210 = vector.shape_cast %209 : vector<8xf32> to vector<8x1xf32>
    %211 = vector.broadcast %210 : vector<8x1xf32> to vector<8x8xf32>
    %212 = arith.subf %208, %211 : vector<8x8xf32>
    %213 = math.exp %212 : vector<8x8xf32>
    %cst_96 = arith.constant dense<0.000000e+00> : vector<8xf32>
    %214 = vector.multi_reduction <add>, %213, %cst_96 [1] : vector<8x8xf32> to vector<8xf32>
    %215 = vector.shape_cast %214 : vector<8xf32> to vector<8x1xf32>
    %216 = vector.broadcast %215 : vector<8x1xf32> to vector<8x8xf32>
    %217 = arith.divf %213, %216 : vector<8x8xf32>
    %218 = arith.truncf %217 : vector<8x8xf32> to vector<8x8xbf16>
    %219 = vector.extract_strided_slice %188 {offsets = [0, 16], sizes = [8, 16], strides = [1, 1]} : vector<8x32xbf16> to vector<8x16xbf16>
    %cst_97 = arith.constant dense<0.000000e+00> : vector<8x16xf32>
    %220 = tpu.matmul %218, %219, %cst_97 {dimension_numbers = #tpu.dot_dimension_numbers<[1], [0], [0], [1], [0, 0, 1, 1], [], []>} : vector<8x8xbf16>, vector<8x16xbf16>, vector<8x16xf32> -> vector<8x16xf32>
    %221 = tpu.concatenate %204, %220 in 1 : vector<8x16xf32>, vector<8x16xf32> -> vector<8x32xf32>
    %222 = arith.truncf %221 : vector<8x32xf32> to vector<8x32xbf16>
    %c1_98 = arith.constant 1 : index
    %c0_99 = arith.constant 0 : index
    %c0_100 = arith.constant 0 : index
    %223 = vector.load %arg9[%c1_98, %c0_99, %c0_100] : memref<2x32x32xbf16, #tpu.memory_space<vmem>>, vector<1x32x32xbf16>
    %224 = vector.shape_cast %223 : vector<1x32x32xbf16> to vector<32x32xbf16>
    %cst_101 = arith.constant dense<0.000000e+00> : vector<8x32xf32>
    %225 = tpu.matmul %222, %224, %cst_101 {dimension_numbers = #tpu.dot_dimension_numbers<[1], [0], [0], [1], [0, 0, 1, 1], [], []>} : vector<8x32xbf16>, vector<32x32xbf16>, vector<8x32xf32> -> vector<8x32xf32>
    %c1_102 = arith.constant 1 : index
    %c0_103 = arith.constant 0 : index
    %c0_104 = arith.constant 0 : index
    %226 = vector.load %arg10[%c1_102, %c0_103, %c0_104] : memref<2x1x32xf32, #tpu.memory_space<vmem>>, vector<1x1x32xf32>
    %227 = vector.shape_cast %226 : vector<1x1x32xf32> to vector<1x32xf32>
    %228 = vector.broadcast %227 : vector<1x32xf32> to vector<8x32xf32>
    %229 = arith.addf %225, %228 : vector<8x32xf32>
    %230 = arith.addf %148, %229 : vector<8x32xf32>
    %c1_105 = arith.constant 1 : index
    %c0_106 = arith.constant 0 : index
    %c0_107 = arith.constant 0 : index
    %231 = vector.load %arg11[%c1_105, %c0_106, %c0_107] : memref<2x1x32xf32, #tpu.memory_space<vmem>>, vector<1x1x32xf32>
    %232 = vector.shape_cast %231 : vector<1x1x32xf32> to vector<1x32xf32>
    %c1_108 = arith.constant 1 : index
    %c0_109 = arith.constant 0 : index
    %c0_110 = arith.constant 0 : index
    %233 = vector.load %arg12[%c1_108, %c0_109, %c0_110] : memref<2x1x32xf32, #tpu.memory_space<vmem>>, vector<1x1x32xf32>
    %234 = vector.shape_cast %233 : vector<1x1x32xf32> to vector<1x32xf32>
    %cst_111 = arith.constant dense<0.000000e+00> : vector<8xf32>
    %235 = vector.multi_reduction <add>, %230, %cst_111 [1] : vector<8x32xf32> to vector<8xf32>
    %236 = vector.shape_cast %235 : vector<8xf32> to vector<8x1xf32>
    %cst_112 = arith.constant 3.200000e+01 : f32
    %237 = vector.broadcast %cst_112 : f32 to vector<8x1xf32>
    %238 = arith.divf %236, %237 : vector<8x1xf32>
    %239 = vector.broadcast %238 : vector<8x1xf32> to vector<8x32xf32>
    %240 = arith.subf %230, %239 : vector<8x32xf32>
    %241 = arith.mulf %240, %240 : vector<8x32xf32>
    %cst_113 = arith.constant dense<0.000000e+00> : vector<8xf32>
    %242 = vector.multi_reduction <add>, %241, %cst_113 [1] : vector<8x32xf32> to vector<8xf32>
    %243 = vector.shape_cast %242 : vector<8xf32> to vector<8x1xf32>
    %cst_114 = arith.constant 3.200000e+01 : f32
    %244 = vector.broadcast %cst_114 : f32 to vector<8x1xf32>
    %245 = arith.divf %243, %244 : vector<8x1xf32>
    %cst_115 = arith.constant 9.99999974E-6 : f32
    %246 = vector.broadcast %cst_115 : f32 to vector<8x1xf32>
    %247 = arith.addf %245, %246 : vector<8x1xf32>
    %248 = math.rsqrt %247 : vector<8x1xf32>
    %249 = vector.broadcast %248 : vector<8x1xf32> to vector<8x32xf32>
    %250 = arith.mulf %240, %249 : vector<8x32xf32>
    %251 = vector.broadcast %232 : vector<1x32xf32> to vector<8x32xf32>
    %252 = arith.mulf %250, %251 : vector<8x32xf32>
    %253 = vector.broadcast %234 : vector<1x32xf32> to vector<8x32xf32>
    %254 = arith.addf %252, %253 : vector<8x32xf32>
    %255 = arith.truncf %254 : vector<8x32xf32> to vector<8x32xbf16>
    %c1_116 = arith.constant 1 : index
    %c0_117 = arith.constant 0 : index
    %c0_118 = arith.constant 0 : index
    %256 = vector.load %arg13[%c1_116, %c0_117, %c0_118] : memref<2x32x128xbf16, #tpu.memory_space<vmem>>, vector<1x32x128xbf16>
    %257 = vector.shape_cast %256 : vector<1x32x128xbf16> to vector<32x128xbf16>
    %cst_119 = arith.constant dense<0.000000e+00> : vector<8x128xf32>
    %258 = tpu.matmul %255, %257, %cst_119 {dimension_numbers = #tpu.dot_dimension_numbers<[1], [0], [0], [1], [0, 0, 1, 1], [], []>} : vector<8x32xbf16>, vector<32x128xbf16>, vector<8x128xf32> -> vector<8x128xf32>
    %c1_120 = arith.constant 1 : index
    %c0_121 = arith.constant 0 : index
    %c0_122 = arith.constant 0 : index
    %259 = vector.load %arg14[%c1_120, %c0_121, %c0_122] : memref<2x1x128xf32, #tpu.memory_space<vmem>>, vector<1x1x128xf32>
    %260 = vector.shape_cast %259 : vector<1x1x128xf32> to vector<1x128xf32>
    %261 = vector.broadcast %260 : vector<1x128xf32> to vector<8x128xf32>
    %262 = arith.addf %258, %261 : vector<8x128xf32>
    %cst_123 = arith.constant 5.000000e-01 : f32
    %263 = vector.broadcast %cst_123 : f32 to vector<8x128xf32>
    %264 = arith.mulf %263, %262 : vector<8x128xf32>
    %cst_124 = arith.constant 4.471500e-02 : f32
    %265 = vector.broadcast %cst_124 : f32 to vector<8x128xf32>
    %266 = arith.mulf %265, %262 : vector<8x128xf32>
    %267 = arith.mulf %266, %262 : vector<8x128xf32>
    %268 = arith.mulf %267, %262 : vector<8x128xf32>
    %269 = arith.addf %262, %268 : vector<8x128xf32>
    %cst_125 = arith.constant 0.797884583 : f32
    %270 = vector.broadcast %cst_125 : f32 to vector<8x128xf32>
    %271 = arith.mulf %270, %269 : vector<8x128xf32>
    %272 = math.tanh %271 : vector<8x128xf32>
    %cst_126 = arith.constant 1.000000e+00 : f32
    %273 = vector.broadcast %cst_126 : f32 to vector<8x128xf32>
    %274 = arith.addf %273, %272 : vector<8x128xf32>
    %275 = arith.mulf %264, %274 : vector<8x128xf32>
    %276 = arith.truncf %275 : vector<8x128xf32> to vector<8x128xbf16>
    %c1_127 = arith.constant 1 : index
    %c0_128 = arith.constant 0 : index
    %c0_129 = arith.constant 0 : index
    %277 = vector.load %arg15[%c1_127, %c0_128, %c0_129] : memref<2x128x32xbf16, #tpu.memory_space<vmem>>, vector<1x128x32xbf16>
    %278 = vector.shape_cast %277 : vector<1x128x32xbf16> to vector<128x32xbf16>
    %cst_130 = arith.constant dense<0.000000e+00> : vector<8x32xf32>
    %279 = tpu.matmul %276, %278, %cst_130 {dimension_numbers = #tpu.dot_dimension_numbers<[1], [0], [0], [1], [0, 0, 1, 1], [], []>} : vector<8x128xbf16>, vector<128x32xbf16>, vector<8x32xf32> -> vector<8x32xf32>
    %c1_131 = arith.constant 1 : index
    %c0_132 = arith.constant 0 : index
    %c0_133 = arith.constant 0 : index
    %280 = vector.load %arg16[%c1_131, %c0_132, %c0_133] : memref<2x1x32xf32, #tpu.memory_space<vmem>>, vector<1x1x32xf32>
    %281 = vector.shape_cast %280 : vector<1x1x32xf32> to vector<1x32xf32>
    %282 = vector.broadcast %281 : vector<1x32xf32> to vector<8x32xf32>
    %283 = arith.addf %279, %282 : vector<8x32xf32>
    %284 = arith.addf %230, %283 : vector<8x32xf32>
    %c0_134 = arith.constant 0 : index
    %c0_135 = arith.constant 0 : index
    %285 = vector.load %arg17[%c0_134, %c0_135] : memref<1x32xf32, #tpu.memory_space<vmem>>, vector<1x32xf32>
    %c0_136 = arith.constant 0 : index
    %c0_137 = arith.constant 0 : index
    %286 = vector.load %arg18[%c0_136, %c0_137] : memref<1x32xf32, #tpu.memory_space<vmem>>, vector<1x32xf32>
    %cst_138 = arith.constant dense<0.000000e+00> : vector<8xf32>
    %287 = vector.multi_reduction <add>, %284, %cst_138 [1] : vector<8x32xf32> to vector<8xf32>
    %288 = vector.shape_cast %287 : vector<8xf32> to vector<8x1xf32>
    %cst_139 = arith.constant 3.200000e+01 : f32
    %289 = vector.broadcast %cst_139 : f32 to vector<8x1xf32>
    %290 = arith.divf %288, %289 : vector<8x1xf32>
    %291 = vector.broadcast %290 : vector<8x1xf32> to vector<8x32xf32>
    %292 = arith.subf %284, %291 : vector<8x32xf32>
    %293 = arith.mulf %292, %292 : vector<8x32xf32>
    %cst_140 = arith.constant dense<0.000000e+00> : vector<8xf32>
    %294 = vector.multi_reduction <add>, %293, %cst_140 [1] : vector<8x32xf32> to vector<8xf32>
    %295 = vector.shape_cast %294 : vector<8xf32> to vector<8x1xf32>
    %cst_141 = arith.constant 3.200000e+01 : f32
    %296 = vector.broadcast %cst_141 : f32 to vector<8x1xf32>
    %297 = arith.divf %295, %296 : vector<8x1xf32>
    %cst_142 = arith.constant 9.99999974E-6 : f32
    %298 = vector.broadcast %cst_142 : f32 to vector<8x1xf32>
    %299 = arith.addf %297, %298 : vector<8x1xf32>
    %300 = math.rsqrt %299 : vector<8x1xf32>
    %301 = vector.broadcast %300 : vector<8x1xf32> to vector<8x32xf32>
    %302 = arith.mulf %292, %301 : vector<8x32xf32>
    %303 = vector.broadcast %285 : vector<1x32xf32> to vector<8x32xf32>
    %304 = arith.mulf %302, %303 : vector<8x32xf32>
    %305 = vector.broadcast %286 : vector<1x32xf32> to vector<8x32xf32>
    %306 = arith.addf %304, %305 : vector<8x32xf32>
    %c0_143 = arith.constant 0 : index
    %c0_144 = arith.constant 0 : index
    %307 = vector.load %arg19[%c0_143, %c0_144] : memref<32x128xf32, #tpu.memory_space<vmem>>, vector<32x128xf32>
    %cst_145 = arith.constant dense<0.000000e+00> : vector<8x128xf32>
    %308 = tpu.matmul %306, %307, %cst_145 {dimension_numbers = #tpu.dot_dimension_numbers<[1], [0], [0], [1], [0, 0, 1, 1], [], []>} : vector<8x32xf32>, vector<32x128xf32>, vector<8x128xf32> -> vector<8x128xf32>
    %c0_146 = arith.constant 0 : index
    %c0_147 = arith.constant 0 : index
    %309 = vector.load %arg20[%c0_146, %c0_147] : memref<1x128xf32, #tpu.memory_space<vmem>>, vector<1x128xf32>
    %310 = vector.broadcast %309 : vector<1x128xf32> to vector<8x128xf32>
    %311 = arith.addf %308, %310 : vector<8x128xf32>
    %c0_148 = arith.constant 0 : index
    %c0_149 = arith.constant 0 : index
    %312 = vector.load %arg21[%c0_148, %c0_149] : memref<8x128xf32, #tpu.memory_space<vmem>>, vector<8x128xf32>
    tpu.vector_store %arg21[%c0_148, %c0_149], %311 {strides = array<i32>} : memref<8x128xf32, #tpu.memory_space<vmem>>, vector<8x128xf32>,
    return
  }
  func.func @transform_0(%arg0: i32) -> (i32, i32, i32) {
    %c0_i32 = arith.constant 0 : i32
    %c0_i32_0 = arith.constant 0 : i32
    %c0_i32_1 = arith.constant 0 : i32
    return %arg0, %c0_i32, %c0_i32_0 : i32, i32, i32
  }
  func.func @transform_1(%arg0: i32) -> (i32, i32, i32) {
    %c0_i32 = arith.constant 0 : i32
    %c0_i32_0 = arith.constant 0 : i32
    %c0_i32_1 = arith.constant 0 : i32
    return %arg0, %c0_i32, %c0_i32_0 : i32, i32, i32
  }
  func.func @transform_2(%arg0: i32) -> (i32, i32) {
    %c0_i32 = arith.constant 0 : i32
    %c0_i32_0 = arith.constant 0 : i32
    %c0_i32_1 = arith.constant 0 : i32
    return %c0_i32, %c0_i32_0 : i32, i32
  }
  func.func @transform_3(%arg0: i32) -> (i32, i32) {
    %c0_i32 = arith.constant 0 : i32
    %c0_i32_0 = arith.constant 0 : i32
    %c0_i32_1 = arith.constant 0 : i32
    return %c0_i32, %c0_i32_0 : i32, i32
  }
  func.func @transform_4(%arg0: i32) -> (i32, i32, i32) {
    %c0_i32 = arith.constant 0 : i32
    %c0_i32_0 = arith.constant 0 : i32
    %c0_i32_1 = arith.constant 0 : i32
    %c0_i32_2 = arith.constant 0 : i32
    return %c0_i32, %c0_i32_0, %c0_i32_1 : i32, i32, i32
  }
  func.func @transform_5(%arg0: i32) -> (i32, i32, i32) {
    %c0_i32 = arith.constant 0 : i32
    %c0_i32_0 = arith.constant 0 : i32
    %c0_i32_1 = arith.constant 0 : i32
    %c0_i32_2 = arith.constant 0 : i32
    return %c0_i32, %c0_i32_0, %c0_i32_1 : i32, i32, i32
  }
  func.func @transform_6(%arg0: i32) -> (i32, i32, i32) {
    %c0_i32 = arith.constant 0 : i32
    %c0_i32_0 = arith.constant 0 : i32
    %c0_i32_1 = arith.constant 0 : i32
    %c0_i32_2 = arith.constant 0 : i32
    return %c0_i32, %c0_i32_0, %c0_i32_1 : i32, i32, i32
  }
  func.func @transform_7(%arg0: i32) -> (i32, i32, i32) {
    %c0_i32 = arith.constant 0 : i32
    %c0_i32_0 = arith.constant 0 : i32
    %c0_i32_1 = arith.constant 0 : i32
    %c0_i32_2 = arith.constant 0 : i32
    return %c0_i32, %c0_i32_0, %c0_i32_1 : i32, i32, i32
  }
  func.func @transform_8(%arg0: i32) -> (i32, i32, i32) {
    %c0_i32 = arith.constant 0 : i32
    %c0_i32_0 = arith.constant 0 : i32
    %c0_i32_1 = arith.constant 0 : i32
    %c0_i32_2 = arith.constant 0 : i32
    return %c0_i32, %c0_i32_0, %c0_i32_1 : i32, i32, i32
  }
  func.func @transform_9(%arg0: i32) -> (i32, i32, i32) {
    %c0_i32 = arith.constant 0 : i32
    %c0_i32_0 = arith.constant 0 : i32
    %c0_i32_1 = arith.constant 0 : i32
    %c0_i32_2 = arith.constant 0 : i32
    return %c0_i32, %c0_i32_0, %c0_i32_1 : i32, i32, i32
  }
  func.func @transform_10(%arg0: i32) -> (i32, i32, i32) {
    %c0_i32 = arith.constant 0 : i32
    %c0_i32_0 = arith.constant 0 : i32
    %c0_i32_1 = arith.constant 0 : i32
    %c0_i32_2 = arith.constant 0 : i32
    return %c0_i32, %c0_i32_0, %c0_i32_1 : i32, i32, i32
  }
  func.func @transform_11(%arg0: i32) -> (i32, i32, i32) {
    %c0_i32 = arith.constant 0 : i32
    %c0_i32_0 = arith.constant 0 : i32
    %c0_i32_1 = arith.constant 0 : i32
    %c0_i32_2 = arith.constant 0 : i32
    return %c0_i32, %c0_i32_0, %c0_i32_1 : i32, i32, i32
  }
  func.func @transform_12(%arg0: i32) -> (i32, i32, i32) {
    %c0_i32 = arith.constant 0 : i32
    %c0_i32_0 = arith.constant 0 : i32
    %c0_i32_1 = arith.constant 0 : i32
    %c0_i32_2 = arith.constant 0 : i32
    return %c0_i32, %c0_i32_0, %c0_i32_1 : i32, i32, i32
  }
  func.func @transform_13(%arg0: i32) -> (i32, i32, i32) {
    %c0_i32 = arith.constant 0 : i32
    %c0_i32_0 = arith.constant 0 : i32
    %c0_i32_1 = arith.constant 0 : i32
    %c0_i32_2 = arith.constant 0 : i32
    return %c0_i32, %c0_i32_0, %c0_i32_1 : i32, i32, i32
  }
  func.func @transform_14(%arg0: i32) -> (i32, i32, i32) {
    %c0_i32 = arith.constant 0 : i32
    %c0_i32_0 = arith.constant 0 : i32
    %c0_i32_1 = arith.constant 0 : i32
    %c0_i32_2 = arith.constant 0 : i32
    return %c0_i32, %c0_i32_0, %c0_i32_1 : i32, i32, i32
  }
  func.func @transform_15(%arg0: i32) -> (i32, i32, i32) {
    %c0_i32 = arith.constant 0 : i32
    %c0_i32_0 = arith.constant 0 : i32
    %c0_i32_1 = arith.constant 0 : i32
    %c0_i32_2 = arith.constant 0 : i32
    return %c0_i32, %c0_i32_0, %c0_i32_1 : i32, i32, i32
  }
  func.func @transform_16(%arg0: i32) -> (i32, i32) {
    %c0_i32 = arith.constant 0 : i32
    %c0_i32_0 = arith.constant 0 : i32
    %c0_i32_1 = arith.constant 0 : i32
    return %c0_i32, %c0_i32_0 : i32, i32
  }
  func.func @transform_17(%arg0: i32) -> (i32, i32) {
    %c0_i32 = arith.constant 0 : i32
    %c0_i32_0 = arith.constant 0 : i32
    %c0_i32_1 = arith.constant 0 : i32
    return %c0_i32, %c0_i32_0 : i32, i32
  }
  func.func @transform_18(%arg0: i32) -> (i32, i32) {
    %c0_i32 = arith.constant 0 : i32
    %c0_i32_0 = arith.constant 0 : i32
    %c0_i32_1 = arith.constant 0 : i32
    return %c0_i32, %c0_i32_0 : i32, i32
  }
  func.func @transform_19(%arg0: i32) -> (i32, i32) {
    %c0_i32 = arith.constant 0 : i32
    %c0_i32_0 = arith.constant 0 : i32
    %c0_i32_1 = arith.constant 0 : i32
    return %c0_i32, %c0_i32_0 : i32, i32
  }
  func.func @transform_20(%arg0: i32) -> (i32, i32) {
    %c0_i32 = arith.constant 0 : i32
    %c0_i32_0 = arith.constant 0 : i32
    return %arg0, %c0_i32 : i32, i32
  }
}

</mosaic_0001>

<bundles_post_ra>
// kernel: squeeze.1
= control target key start
LH: loop header
LB: loop body
LE: loop exit
PB: predicated region body
PF: predicated region fallthrough
CT: control target
= control target key end

     0   :  { %s77_s0 = inlined_call_operand.vmem [shape: f32[16], index: 0, kind: input, shape index: {}]   ;;  %s78_s1 = inlined_call_operand.hbm [shape: f32[2,8], index: 1, kind: output, shape index: {}]  }
   0x1   :  { %v6_v0 = vld [vmem:[%s77_s0] sm:$0x1] }
   0x2   :  { %2 = vsyncpa [#allocation1], 0  ;;  %7 = vst [vmem:[#allocation3] sm:$0x1] %v6_v0  ;;  %vm9_vm0 = vcmask 64512   ;;  %s59_s0 = smov 120  }
   0x3   :  { %s60_s8 = smov [#allocation0]  }
   0x4   :  { %s29_s9 = sshll.u32 %s60_s8, 4  ;;  %s30_s9 = int_to_ptr.vmem [resolvable:$true] %s29_s9 }
   0x5   :  { %s37_s10 = scalar_lea.vmem %s30_s9, 32  ;;  %p42_p1 = scmp.lt.s32.totalorder %s30_s9, %s30_s9 }
   0x6   :  { %p38_p0 = scmp.ne.s32.totalorder %s30_s9, %s37_s10  ;;  %p43_p2 = scmp.lt.s32.totalorder %s37_s10, %s37_s10 }
   0x8   :  { %p44_p3 = por %p43_p2, %p42_p1 }
   0x9   :  { %v11_v1 = vld [vmem:[#allocation3] sm:$0x1]  }
   0xa   :  { %v8_v2 = vld [vmem:[#allocation3] sm:$0x1]   ;;  %12 = vrot.lane.b32.xlu0 %v11_v1, %s59_s0  ;;  %p45_p4 = pnand %p44_p3, %p38_p0 }
   0xb   :  { %10 = vst.msk [vmem:[#allocation2] sm:$0x1] %vm9_vm0, %v8_v2  }
  0x7c   :  { %v13_v3 = vpop.permute.xlu0 %12  }
  0x7d   :  { %16 = vst.msk [vmem:[#allocation2 + $0x1] sm:$0x1] %vm9_vm0, %v13_v3  }
  0x84   :  { %v21_v4 = vld [vmem:[#allocation2] sm:$0x3] }
  0x85   :  { %24 = vst [vmem:[#allocation0] sm:$0x3] %v21_v4 }
  0x86   :  { %48 = shalt.err (!%p45_p4)
}
  0x87   :  { %32 = dma.vmem_to_hbm [thread:$0]  %s30_s9, 32, %s78_s1, [#allocation1]  }
  0x88   :  { %57 = dma.done.wait [#allocation1], 32  }
  0x89   :  { %58 = vsyncadd [#allocation1], 4294967264 }
  0x8a   :  { %34 = vsyncpa [#allocation1], 1 }

// kernel: _lambda_.1
= control target key start
LH: loop header
LB: loop body
LE: loop exit
PB: predicated region body
PF: predicated region fallthrough
CT: control target
= control target key end

     0   :  { %s3379_s0 = inlined_call_operand.vmem [shape: s32[2,8,1], index: 0, kind: input, shape index: {}]   ;;  %s3380_s1 = inlined_call_operand.vmem [shape: f32[2,8,8], index: 1, kind: input, shape index: {}]   ;;  %s3381_s2 = inlined_call_operand.vmem [shape: f32[64,32], index: 2, kind: input, shape index: {}]   ;;  %s3382_s3 = inlined_call_operand.vmem [shape: f32[8,32], index: 3, kind: input, shape index: {}]   ;;  %s3383_s4 = inlined_call_operand.vmem [shape: f32[2,1,32], index: 4, kind: input, shape index: {}, may-alias: {4,10}]   ;;  %s3384_s5 = inlined_call_operand.vmem [shape: f32[2,1,32], index: 5, kind: input, shape index: {}, may-alias: {5,9,11,15}]   ;;  %s3385_s6 = inlined_call_operand.hbm [shape: bf16[2,32,96], index: 6, kind: input, shape index: {}]   ;;  %s3386_s7 = inlined_call_operand.vmem [shape: f32[2,1,96], index: 7, kind: input, shape index: {}]   ;;  %s3387_s8 = inlined_call_operand.hbm [shape: bf16[2,32,32], index: 8, kind: input, shape index: {}]   ;;  %s3388_s9 = inlined_call_operand.vmem [shape: f32[2,1,32], index: 9, kind: input, shape index: {}, may-alias: {5,9,11,15}]   ;;  %s3389_s10 = inlined_call_operand.vmem [shape: f32[2,1,32], index: 10, kind: input, shape index: {}, may-alias: {4,10}]   ;;  %s3390_s11 = inlined_call_operand.vmem [shape: f32[2,1,32], index: 11, kind: input, shape index: {}, may-alias: {5,9,11,15}]   ;;  %s3391_s12 = inlined_call_operand.hbm [shape: bf16[2,32,128], index: 12, kind: input, shape index: {}]   ;;  %s3392_s13 = inlined_call_operand.vmem [shape: f32[2,1,128], index: 13, kind: input, shape index: {}]   ;;  %s3393_s14 = inlined_call_operand.hbm [shape: bf16[2,128,32], index: 14, kind: input, shape index: {}]   ;;  %s3394_s15 = inlined_call_operand.vmem [shape: f32[2,1,32], index: 15, kind: input, shape index: {}, may-alias: {5,9,11,15}]   ;;  %s3395_s16 = inlined_call_operand.vmem [shape: f32[1,32], index: 16, kind: input, shape index: {}]   ;;  %s3396_s17 = inlined_call_operand.vmem [shape: f32[1,32], index: 17, kind: input, shape index: {}]   ;;  %s3397_s18 = inlined_call_operand.hbm [shape: f32[32,128], index: 18, kind: input, shape index: {}]   ;;  %s3398_s19 = inlined_call_operand.vmem [shape: f32[1,128], index: 19, kind: input, shape index: {}]   ;;  %s3399_s20 = inlined_call_operand.vmem [shape: f32[16,128], index: 20, kind: output, shape index: {}]  }
   0x1   :  { %3403 = sst [smem:[#allocation13_spill]] %s3379_s0 }
   0x2   :  { %3404 = sst [smem:[#allocation14_spill]] %s3380_s1 }
   0x3   :  { %3405 = sst [smem:[#allocation15_spill]] %s3381_s2 }
   0x4   :  { %3406 = sst [smem:[#allocation16_spill]] %s3382_s3 }
   0x5   :  { %3407 = sst [smem:[#allocation17_spill]] %s3383_s4 }
   0x6   :  { %25 = vsyncpa [#allocation3], 0 }
   0x7   :  { %26 = vsyncpa [#allocation5], 0 }
   0x8   :  { %27 = vsyncpa [#allocation8], 0  ;;  %s3003_s1 = smov 0  }
   0x9 LB: > { %s3009_s22 = sadd.s32 4294967295, %s2878_s1   ;;  %p2277_p0 = scmp.ge.s32.totalorder %s2878_s1, 1  ;;  %s2878_s1 = sphi %s3003_s1, %s33_s1  }
   0xa   : > { %p494_p1 = scmp.lt.s32.totalorder %s2878_s1, 3  ;;  %p2635_p2 = scmp.eq.s32.totalorder %s3009_s22, 0 }
   0xb   : > { %s2880_s24 = smov [#allocation4]   ;;  %s2881_s25 = smov [#allocation7]  }
   0xc   : > { %p3014_p3 = pnand %p2277_p0, %p494_p1  ;;  %s534_s2 = sshll.u32 %s2880_s24, 4  ;;  %s535_s2 = int_to_ptr.vmem [resolvable:$true] %s534_s2 }
   0xd   : > { %s572_s3 = sshll.u32 %s2881_s25, 4  ;;  %s2882_s27 = smov [#allocation2]   ;;  %s3020_s3 = int_to_ptr.vmem [resolvable:$true] %s572_s3 }
   0xe   : > { %p2619_p4 = pneg %p3014_p3  ;;  %s518_s28 = sshll.u32 %s2882_s27, 4  ;;  %s3028_s28 = int_to_ptr.vmem [resolvable:$true] %s518_s28 }
   0xf   : > { %s2883_s4 = smov [#allocation6]   ;;  %s2741_s0 = scalar_lea.vmem %s535_s2, 512 }
  0x10   : > { %p3024_p5 = pnand %p2635_p2, %p2619_p4  ;;  %s3030_s29 = sshll.u32 %s2883_s4, 4  ;;  %s557_s29 = int_to_ptr.vmem [resolvable:$true] %s3030_s29 }
  0x11   : > { %p2742_p7 = scmp.ne.s32.totalorder %s535_s2, %s2741_s0  ;;  %p2749_p10 = scmp.lt.s32.totalorder %s535_s2, %s535_s2 }
  0x12   : > { %p3034_p6 = pneg %p3024_p5  ;;  %p2750_p11 = scmp.lt.s32.totalorder %s2741_s0, %s2741_s0 }
  0x14   : > { %p2744_p8 = pnand %p2742_p7, %p3034_p6  ;;  %p2751_p12 = por %p2750_p11, %p2749_p10 }
  0x16   : > { %p2745_p9 = pneg %p2744_p8 }
  0x18   : > { %p2752_p13 = pnand %p2751_p12, %p2745_p9 }
  0x1a   : > { %2755 = shalt.err (!%p2752_p13)
}
  0x1b   : > { %s2884_s21 = smov 64   ;;  %s2885_s24 = smov 4  }
  0x1c   : > { %2625 = dma.hbm_to_vmem [thread:$0]  (!%p3024_p5), %s3387_s8, 512, %s535_s2, [#allocation5], %s2884_s21, %s2884_s21, %s2885_s24  }
  0x1d   : > { %s2767_s4 = scalar_lea.vmem %s3020_s3, 2048  ;;  %p2775_p7 = scmp.lt.s32.totalorder %s3020_s3, %s3020_s3 }
  0x1e   : > { %p2768_p0 = scmp.ne.s32.totalorder %s3020_s3, %s2767_s4  ;;  %p2776_p8 = scmp.lt.s32.totalorder %s2767_s4, %s2767_s4 }
  0x20   : > { %p2770_p1 = pnand %p2768_p0, %p3034_p6  ;;  %p2777_p9 = por %p2776_p8, %p2775_p7 }
  0x22   : > { %p2771_p4 = pneg %p2770_p1 }
  0x24   : > { %p2778_p10 = pnand %p2777_p9, %p2771_p4 }
  0x26   : > { %2781 = shalt.err (!%p2778_p10)
}
  0x27   : > { %2631 = dma.hbm_to_vmem [thread:$0]  (!%p3024_p5), %s3393_s14, 2048, %s3020_s3, [#allocation8], %s2884_s21, %s2884_s21, %s2885_s24  }
  0x28   : > { %s2793_s2 = scalar_lea.vmem %s3028_s28, 512  ;;  %p2801_p0 = scmp.lt.s32.totalorder %s3028_s28, %s3028_s28 }
  0x29   : > { %p2794_p11 = scmp.ne.s32.totalorder %s3028_s28, %s2793_s2  ;;  %p2802_p1 = scmp.lt.s32.totalorder %s2793_s2, %s2793_s2 }
  0x2b   : > { %p2796_p12 = pnand %p2794_p11, %p3034_p6  ;;  %p2803_p4 = por %p2802_p1, %p2801_p0 }
  0x2d   : > { %p2797_p13 = pneg %p2796_p12 }
  0x2f   : > { %p2804_p7 = pnand %p2803_p4, %p2797_p13 }
  0x31   : > { %2807 = shalt.err (!%p2804_p7)
}
  0x32   : > { %2622 = dma.hbm_to_vmem [thread:$0]  (!%p3024_p5), %s3385_s6, 512, %s3028_s28, [#allocation3], %s2884_s21, %s2884_s21, %s2885_s24  }
  0x33   : > { %s2819_s3 = scalar_lea.vmem %s557_s29, 512  ;;  %p2827_p11 = scmp.lt.s32.totalorder %s557_s29, %s557_s29 }
  0x34   : > { %p2820_p8 = scmp.ne.s32.totalorder %s557_s29, %s2819_s3  ;;  %p2828_p12 = scmp.lt.s32.totalorder %s2819_s3, %s2819_s3 }
  0x36   : > { %p2822_p9 = pnand %p2820_p8, %p3034_p6  ;;  %p2829_p13 = por %p2828_p12, %p2827_p11 }
  0x38   : > { %p2823_p10 = pneg %p2822_p9 }
  0x3a   : > { %p2830_p0 = pnand %p2829_p13, %p2823_p10 }
  0x3c   : > { %2833 = shalt.err (!%p2830_p0)
}
  0x3d   : > { %2628 = dma.hbm_to_vmem [thread:$0]  (!%p3024_p5), %s3391_s12, 512, %s557_s29, [#allocation5], %s2884_s21, %s2884_s21, %s2885_s24  }
  0x3e   : > { %s2886_s28 = smov [#allocation9]  }
  0x3f   : > { %s594_s2 = sshll.u32 %s2886_s28, 4  ;;  %s595_s2 = int_to_ptr.vmem [resolvable:$true] %s594_s2 }
  0x40   : > { %s2845_s27 = scalar_lea.vmem %s595_s2, 512  ;;  %p2853_p8 = scmp.lt.s32.totalorder %s595_s2, %s595_s2 }
  0x41   : > { %p2846_p1 = scmp.ne.s32.totalorder %s595_s2, %s2845_s27  ;;  %p2854_p9 = scmp.lt.s32.totalorder %s2845_s27, %s2845_s27 }
  0x43   : > { %p2848_p4 = pnand %p2846_p1, %p3034_p6  ;;  %p2855_p10 = por %p2854_p9, %p2853_p8 }
  0x45   : > { %p2849_p7 = pneg %p2848_p4 }
  0x47   : > { %p2856_p11 = pnand %p2855_p10, %p2849_p7 }
  0x49   : > { %2859 = shalt.err (!%p2856_p11)
}
  0x4a   : > { %s2887_s4 = smov 128   ;;  %s2888_s3 = smov 8  }
  0x4b   : > { %2634 = dma.hbm_to_vmem [thread:$0]  (!%p3024_p5), %s3397_s18, 512, %s595_s2, [#allocation8], %s2887_s4, %s2887_s4, %s2888_s3  }
  0x4c   : > { %627 = sbr.rel (%p3014_p3) target bundleno = 6202 (0x183a), region = 100 }
  0x51   : > { %2865 = dma.done.wait (%p2635_p2), [#allocation3], 512  }
  0x52   : > { %2867 = vsyncadd (%p2635_p2), [#allocation3], 4294966784 }
  0x53   : > { %2869 = dma.done.wait (%p2635_p2), [#allocation5], 1024  }
  0x54   : > { %2871 = vsyncadd (%p2635_p2), [#allocation5], 4294966272 }
  0x55   : > { %2873 = dma.done.wait (%p2635_p2), [#allocation8], 2560  }
  0x56   : > { %2875 = vsyncadd (%p2635_p2), [#allocation8], 4294964736  ;;  %p703_p3 = scmp.lt.s32.totalorder %s3009_s22, 1  ;;  %v2889_v0 = vmov 0   ;;  %v2890_v1 = vmov 0.0   ;;  %s3411_s30 = sld [smem:[#allocation13_spill]]  ;;  %v717_v11 = vlaneseq }
  0x57   : > { %2671 = vset.pattern.permute.xlu0 %v2889_v0  ;;  %2433 = vmatprep.subr.mxu1 %v2890_v1  ;;  %vm2891_vm0 = vmmov 0   ;;  %s3412_s2 = sld [smem:[#allocation15_spill]]  ;;  %vm734_vm1 = vcmask 523264   ;;  %vm811_vm3 = vcmask 261120   ;;  %v2672_v25 = vld [vmem:[#allocation2 + $0x8] sm:$0xff]   ;;  %v2673_v26 = vld [vmem:[#allocation2] sm:$0xff]  }
  0x58   : > { %s3418_s22 = smov (!%p703_p3, %s3009_s22), 1  ;;  %2466 = vmatprep.subr.bf16.mxu0 %v2890_v1  ;;  %2449 = vmatprep.mubr.msk.f32.mxu1 %vm2891_vm0, %v2890_v1  ;;  %v718_v12 = vand.u32 127, %v717_v11  ;;  %s3413_s0 = sld [smem:[#allocation16_spill]]  ;;  %v2296_v33 = vld [vmem:[%s3384_s5] ss:$0 sm:$0xff]  ;;  %vm913_vm4 = vcmask 130048  }
  0x59   : > { %s3114_s23 = sshll.u32 %s3418_s22, 3  ;;  %2468 = vmatprep.mubr.msk.bf16.mxu0 %vm2891_vm0, %v2890_v1  ;;  %s3414_s29 = sld [smem:[#allocation17_spill]]  ;;  %v2297_v37 = vld [vmem:[%s3386_s7] ss:$0 sm:$0xff]  ;;  %vm960_vm5 = vcmask 64512   ;;  %vm978_vm6 = vcmask 1043456  }
  0x5a   : > { %s2892_s27 = smov 96   ;;  %s2893_s22 = smov 80  }
  0x5b   : > { %s2894_s4 = smov 112   ;;  %s3415_s25 = sld [smem:[#allocation14_spill]] }
  0x5c   : > { %s706_s21 = scalar_lea.vmem %s3411_s30, %s3114_s23  ;;  %s2895_s30 = smov 48  }
  0x5d   : > { %v716_v2 = vld [vmem:[%s706_s21] sm:$0xff]  ;;  %v732_v3 = vld [vmem:[%s3412_s2 + $0x38] sm:$0xff]  ;;  %v731_v4 = vld [vmem:[%s3412_s2 + $0x30] sm:$0xff]  ;;  %s2896_s21 = smov 64   ;;  %s3402_s24 = smov 16  }
  0x5e   : > { %720 = vperm.xlu0 %2671, %v716_v2   ;;  %2434 = vmatpush3.msra.mxu1 %v732_v3  ;;  %v730_v5 = vld [vmem:[%s3412_s2 + $0x28] sm:$0xff]  ;;  %v729_v6 = vld [vmem:[%s3412_s2 + $0x20] sm:$0xff]  ;;  %v728_v7 = vld [vmem:[%s3412_s2 + $0x18] sm:$0xff] }
  0x5f   : > { %2435 = vmatprep.subr.mxu1 %v2890_v1  ;;  %v727_v8 = vld [vmem:[%s3412_s2 + $0x10] sm:$0xff]  ;;  %v726_v9 = vld [vmem:[%s3412_s2 + $0x8] sm:$0xff]  ;;  %v725_v10 = vld [vmem:[%s3412_s2] sm:$0xff] }
  0x60   : > { %2436 = vmatpush3.msra.mxu1 %v731_v4  ;;  %v733_v15 = vld [vmem:[%s3413_s0] sm:$0xff]  ;;  %s714_s0 = scalar_lea.vmem %s3399_s20, %s3114_s23 }
  0x61   : > { %2437 = vmatprep.subr.mxu1 %v2890_v1  ;;  %v2295_v31 = vld [vmem:[%s3414_s29] ss:$0 sm:$0xff]  ;;  %s710_s26 = scalar_lea.vmem %s3415_s25, %s3114_s23 }
  0x62   : > { %2438 = vmatpush3.msra.mxu1 %v730_v5  ;;  %v3199_v51 = vld [vmem:[%s710_s26] sm:$0xff] }
  0x63   : > { %2439 = vmatprep.subr.mxu1 %v2890_v1 }
  0x64   : > { %2440 = vmatpush3.msra.mxu1 %v729_v6 }
  0x65   : > { %2441 = vmatprep.subr.mxu1 %v2890_v1 }
  0x66   : > { %2442 = vmatpush3.msra.mxu1 %v728_v7 }
  0x67   : > { %2443 = vmatprep.subr.mxu1 %v2890_v1 }
  0x68   : > { %2444 = vmatpush3.msra.mxu1 %v727_v8 }
  0x69   : > { %2445 = vmatprep.subr.mxu1 %v2890_v1 }
  0x6a   : > { %2446 = vmatpush3.msra.mxu1 %v726_v9 }
  0x6b   : > { %2447 = vmatprep.subr.mxu1 %v2890_v1 }
  0x6c   : > { %2448 = vmatpush3.msra.mxu1 %v725_v10 }
  0x6d   : > { %2452 = vmatprep.subr.bf16.mxu1 %v2890_v1 }
  0xd9   : > { %v721_v13 = vpop.permute.xlu0 %720 }
  0xda   : > { %vm722_vm2 = vcmp.eq.s32.totalorder %v718_v12, %v721_v13 }
  0xdb   : > { %v2293_v14 = vsel %vm722_vm2, 1.0, %v2890_v1 }
  0xdc   : > { %2450 = vmatmul.mubr.msk.f32.vlgmr.msra.gmra.mxu1 %vm734_vm1, %v2293_v14 }
  0xdd   : > { %2456 = vmatprep.mubr.msk.bf16.mxu1 %vm2891_vm0, %v2890_v1  ;;  %2453 = vmatpush3.bf16.msra.mxu1 %v2672_v25  ;;  %v2675_v25 = vld [vmem:[#allocation4] sm:$0xff]  }
  0xde   : > { %2454 = vmatprep.subr.bf16.mxu1 %v2890_v1 }
  0xe1   : > { %2455 = vmatpush3.bf16.msra.mxu1 %v2673_v26 }
  0xe2   : > { %2460 = vmatprep.subr.bf16.mxu1 %v2890_v1 }
 0x19c   : > { %v804_v16 = vpop.f32.mrf.mxu1 }
 0x19d   : > { %v3162_v17 = vadd.f32 %v804_v16, %v733_v15 }
 0x19e   : > { %v2451_v18 = vpop.f32.mrf.mxu1 }
 0x19f   : > { %v812_v19 = vsel %vm811_vm3, %v3162_v17, 0.0 }
 0x1a0   : > { %813 = vadd.xlane.f32.xlu0 %v812_v19 }
 0x229   : > { %v814_v20 = vpop.xlane.xlu0 %813 }
 0x22a   : > { %v816_v21 = vmul.f32 0.03125, %v814_v20 }
 0x22c   : > { %v817_v22 = vsub.f32 %v3162_v17, %v816_v21 }
 0x22e   : > { %v818_v23 = vmul.f32 %v817_v22, %v817_v22 }
 0x230   : > { %v819_v24 = vsel %vm811_vm3, %v818_v23, 0.0 }
 0x231   : > { %820 = vadd.xlane.f32.xlu1 %v819_v24  ;;  %v2674_v24 = vld [vmem:[#allocation4 + $0x8] sm:$0xff]  }
 0x2ba   : > { %v821_v27 = vpop.xlane.xlu1 %820 }
 0x2bb   : > { %v822_v28 = vmul.f32 0.03125, %v821_v27 }
 0x2bd   : > { %v823_v29 = vadd.f32 1e-05, %v822_v28 }
 0x2bf   : > { %2700 = vrsqrt.f32 %v823_v29 }
 0x2cc   : > { %v2701_v30 = vpop.eup %2700 }
 0x2cd   : > { %v825_v32 = vmul.f32 %v2701_v30, %v817_v22 }
 0x2cf   : > { %v832_v34 = vmul.f32 %v2295_v31, %v825_v32 }
 0x2d1   : > { %v839_v35 = vadd.f32 %v2296_v33, %v832_v34 }
 0x2d3   : > { %v840_v36 = vpack.c.bf16 %v839_v35, %v839_v35 }
 0x2d5   : > { %2457 = vmatmul.mubr.msk.bf16.vlgmr.msra.gmra.mxu1 %vm811_vm3, %v840_v36 }
 0x2d6   : > { %2462 = vmatprep.mubr.msk.bf16.mxu1 %vm2891_vm0, %v2890_v1 }
 0x395   : > { %v901_v38 = vpop.f32.mrf.mxu1 }
 0x396   : > { %v902_v39 = vadd.f32 %v2297_v37, %v901_v38  ;;  %v2305_v37 = vld [vmem:[%s3388_s9] ss:$0 sm:$0xff] }
 0x397   : > { %v2458_v40 = vpop.f32.mrf.mxu1 }
 0x398   : > { %v909_v41 = vpack.c.bf16 %v902_v39, %v902_v39  ;;  %v907_v44 = vmul.f32 0.25, %v902_v39 }
 0x399   : > { %v904_v42 = vpop.f32.mrf.mxu1 }
 0x39a   : > { %911 = vrot.lane.b32.xlu1 %v909_v41, %s2892_s27  ;;  %v908_v45 = vpack.c.bf16 %v907_v44, %v907_v44 }
 0x39b   : > { %v2459_v43 = vpop.f32.mrf.mxu1 }
 0x39e   : > { %1025 = vrot.lane.b32.xlu1 %v909_v41, %s2893_s22 }
 0x3a2   : > { %1023 = vrot.lane.b32.xlu1 %v908_v45, %s2894_s4 }
 0x40c   : > { %v912_v46 = vpop.permute.xlu1 %911 }
 0x40d   : > { %v918_v47 = vsel %vm913_vm4, %v912_v46, 0 }
 0x40e   : > { %2461 = vmatpush3.bf16.xpose.msra.mxu1 %v918_v47 }
 0x40f   : > { %2472 = vmatprep.subr.bf16.mxu1 %v2890_v1 }
 0x410   : > { %v1026_v48 = vpop.permute.xlu1 %1025 }
 0x411   : > { %v1031_v49 = vsel %vm913_vm4, %v1026_v48, 0 }
 0x414   : > { %v1024_v50 = vpop.permute.xlu1 %1023 }
 0x415   : > { %2463 = vmatmul.mubr.msk.bf16.vlgmr.msra.gmra.mxu1 %vm913_vm4, %v908_v45 }
 0x416   : > { %2473 = vmatpush3.bf16.xpose.msra.mxu1 %v1031_v49  ;;  %2474 = vmatprep.mubr.msk.bf16.mxu1 %vm2891_vm0, %v2890_v1 }
 0x417   : > { %2484 = vmatprep.subr.bf16.mxu1 %v2890_v1 }
 0x41d   : > { %2475 = vmatmul.mubr.msk.bf16.vlgmr.msra.gmra.mxu1 %vm913_vm4, %v1024_v50  ;;  %v2676_v50 = vld [vmem:[#allocation6 + $0x8] sm:$0xff]  }
 0x41e   : > { %2488 = vmatprep.mubr.msk.bf16.mxu1 %vm2891_vm0, %v2890_v1  ;;  %2485 = vmatpush3.bf16.msra.mxu1 %v2674_v24  ;;  %v2315_v24 = vld [vmem:[%s3394_s15] ss:$0 sm:$0xff] }
 0x41f   : > { %2486 = vmatprep.subr.bf16.mxu1 %v2890_v1 }
 0x422   : > { %2487 = vmatpush3.bf16.msra.mxu1 %v2675_v25 }
 0x423   : > { %2500 = vmatprep.subr.bf16.mxu1 %v2890_v1 }
 0x4d5   : > { %v954_v52 = vpop.f32.mrf.mxu1 }
 0x4d6   : > { %v955_v53 = vadd.f32 %v954_v52, %v3199_v51  ;;  %v2677_v52 = vld [vmem:[#allocation6] sm:$0xff]  }
 0x4d7   : > { %v2464_v54 = vpop.f32.mrf.mxu1 }
 0x4d8   : > { %v961_v55 = vsel %vm960_vm5, %v955_v53, -inf }
 0x4d9   : > { %962 = vmax.xlane.f32.xlu1 %v961_v55  ;;  %v957_v56 = vpop.f32.mrf.mxu1 }
 0x4da   : > { %v2309_v56 = vld [vmem:[%s3389_s10] ss:$0 sm:$0xff] }
 0x4db   : > { %v2465_v57 = vpop.f32.mrf.mxu1 }
 0x4dd   : > { %v1067_v58 = vpop.f32.mrf.mxu1 }
 0x4de   : > { %v1068_v59 = vadd.f32 %v1067_v58, %v3199_v51  ;;  %v2310_v58 = vld [vmem:[%s3390_s11] ss:$0 sm:$0xff] }
 0x4df   : > { %v2476_v60 = vpop.f32.mrf.mxu1 }
 0x4e0   : > { %v1073_v61 = vsel %vm960_vm5, %v1068_v59, -inf }
 0x4e1   : > { %1074 = vmax.xlane.f32.xlu0 %v1073_v61  ;;  %v1070_v62 = vpop.f32.mrf.mxu1 }
 0x4e2   : > { %v2678_v62 = vld [vmem:[#allocation7 + $0x38] sm:$0xff]  }
 0x4e3   : > { %v2477_v63 = vpop.f32.mrf.mxu1 }
 0x4e4   : > { %v2679_v63 = vld [vmem:[#allocation7 + $0x30] sm:$0xff]  }
 0x4ea   : > { %1085 = vrot.lane.b32.xlu1 %v909_v41, %s2895_s30 }
 0x562   : > { %v963_v0 = vpop.xlane.xlu1 %962 }
 0x563   : > { %v964_v2 = vsub.f32 %v955_v53, %v963_v0  ;;  %v2680_v0 = vld [vmem:[#allocation7 + $0x28] sm:$0xff]  }
 0x565   : > { %v965_v3 = vmul.f32 1.442695, %v964_v2  ;;  %v2681_v2 = vld [vmem:[#allocation7 + $0x20] sm:$0xff]  }
 0x566   : > { %v1086_v18 = vpop.permute.xlu1 %1085 }
 0x567   : > { %2702 = vpow2.f32 %v965_v3  ;;  %v1091_v20 = vsel %vm978_vm6, %v1086_v18, 0  ;;  %v2682_v3 = vld [vmem:[#allocation7 + $0x18] sm:$0xff]  }
 0x56a   : > { %v1075_v4 = vpop.xlane.xlu0 %1074 }
 0x56b   : > { %v1076_v5 = vsub.f32 %v1068_v59, %v1075_v4  ;;  %v2683_v4 = vld [vmem:[#allocation7 + $0x10] sm:$0xff]  }
 0x56d   : > { %v1077_v6 = vmul.f32 1.442695, %v1076_v5  ;;  %v2684_v5 = vld [vmem:[#allocation7 + $0x8] sm:$0xff]  }
 0x56f   : > { %2704 = vpow2.f32 %v1077_v6  ;;  %v2685_v6 = vld [vmem:[#allocation7] sm:$0xff]  }
 0x574   : > { %v2703_v7 = vpop.eup %2702 }
 0x575   : > { %v967_v8 = vsel %vm960_vm5, %v2703_v7, 0.0 }
 0x576   : > { %968 = vadd.xlane.f32.xlu0 %v967_v8 }
 0x57c   : > { %v2705_v9 = vpop.eup %2704 }
 0x57d   : > { %v1079_v10 = vsel %vm960_vm5, %v2705_v9, 0.0 }
 0x57e   : > { %1080 = vadd.xlane.f32.xlu0 %v1079_v10 }
 0x594   : > { %973 = vrot.lane.b32.xlu0 %v909_v41, %s2896_s21 }
 0x5ff   : > { %v969_v11 = vpop.xlane.xlu0 %968 }
 0x600   : > { %2706 = vrcp.f32 %v969_v11 }
 0x607   : > { %v1081_v12 = vpop.xlane.xlu0 %1080 }
 0x608   : > { %2708 = vrcp.f32 %v1081_v12 }
 0x60b   : > { %v974_v13 = vpop.permute.xlu0 %973 }
 0x60c   : > { %v980_v14 = vsel %vm978_vm6, %v974_v13, 0 }
 0x60d   : > { %v2707_v15 = vpop.eup %2706  ;;  %2467 = vmatpush3.bf16.msra.mxu0 %v980_v14 }
 0x60e   : > { %2478 = vmatprep.subr.bf16.mxu0 %v2890_v1  ;;  %v971_v16 = vmul.f32 %v2707_v15, %v2703_v7  ;;  %v2311_v7 = vld [vmem:[%s3392_s13] ss:$0 sm:$0xff] }
 0x610   : > { %v972_v19 = vpack.c.bf16 %v971_v16, %v971_v16 }
 0x612   : > { %2469 = vmatmul.mubr.msk.bf16.vlgmr.msra.gmra.mxu0 %vm960_vm5, %v972_v19 }
 0x613   : > { %2479 = vmatpush3.bf16.msra.mxu0 %v1091_v20  ;;  %2480 = vmatprep.mubr.msk.bf16.mxu0 %vm2891_vm0, %v2890_v1 }
 0x614   : > { %2492 = vmatprep.subr.bf16.mxu0 %v2890_v1 }
 0x615   : > { %v2709_v21 = vpop.eup %2708 }
 0x616   : > { %v1083_v22 = vmul.f32 %v2709_v21, %v2705_v9 }
 0x618   : > { %v1084_v23 = vpack.c.bf16 %v1083_v22, %v1083_v22 }
 0x61a   : > { %2481 = vmatmul.mubr.msk.bf16.vlgmr.msra.gmra.mxu0 %vm960_vm5, %v1084_v23 }
 0x61b   : > { %2496 = vmatprep.mubr.msk.bf16.mxu0 %vm2891_vm0, %v2890_v1  ;;  %2493 = vmatpush3.bf16.msra.mxu0 %v2676_v50 }
 0x61c   : > { %2494 = vmatprep.subr.bf16.mxu0 %v2890_v1 }
 0x61f   : > { %2495 = vmatpush3.bf16.msra.mxu0 %v2677_v52 }
 0x620   : > { %2520 = vmatprep.subr.bf16.mxu0 %v2890_v1 }
 0x6d2   : > { %v1016_v26 = vpop.f32.mrf.mxu0 }
 0x6d4   : > { %v2470_v27 = vpop.f32.mrf.mxu0 }
 0x6d6   : > { %v1019_v28 = vpop.f32.mrf.mxu0 }
 0x6d8   : > { %v2471_v29 = vpop.f32.mrf.mxu0 }
 0x6da   : > { %v1127_v30 = vpop.f32.mrf.mxu0 }
 0x6db   : > { %1134 = vrot.lane.b32.xlu0 %v1127_v30, %s3402_s24 }
 0x6dc   : > { %v2482_v31 = vpop.f32.mrf.mxu0 }
 0x6de   : > { %v1130_v32 = vpop.f32.mrf.mxu0 }
 0x6e0   : > { %v2483_v33 = vpop.f32.mrf.mxu0 }
 0x74d   : > { %v1135_v34 = vpop.permute.xlu0 %1134 }
 0x74e   : > { %v1137_v35 = vsel %vm913_vm4, %v1016_v26, %v1135_v34 }
 0x74f   : > { %v1138_v36 = vpack.c.bf16 %v1137_v35, %v1137_v35 }
 0x751   : > { %2489 = vmatmul.mubr.msk.bf16.vlgmr.msra.gmra.mxu1 %vm811_vm3, %v1138_v36 }
 0x752   : > { %2516 = vmatprep.mubr.msk.bf16.mxu1 %vm2891_vm0, %v2890_v1  ;;  %2501 = vmatpush3.bf16.msra.mxu1 %v2678_v62 }
 0x753   : > { %2502 = vmatprep.subr.bf16.mxu1 %v2890_v1 }
 0x756   : > { %2503 = vmatpush3.bf16.msra.mxu1 %v2679_v63 }
 0x757   : > { %2504 = vmatprep.subr.bf16.mxu1 %v2890_v1 }
 0x75a   : > { %2505 = vmatpush3.bf16.msra.mxu1 %v2680_v0 }
 0x75b   : > { %2506 = vmatprep.subr.bf16.mxu1 %v2890_v1 }
 0x75e   : > { %2507 = vmatpush3.bf16.msra.mxu1 %v2681_v2 }
 0x75f   : > { %2508 = vmatprep.subr.bf16.mxu1 %v2890_v1 }
 0x762   : > { %2509 = vmatpush3.bf16.msra.mxu1 %v2682_v3 }
 0x763   : > { %2510 = vmatprep.subr.bf16.mxu1 %v2890_v1 }
 0x766   : > { %2511 = vmatpush3.bf16.msra.mxu1 %v2683_v4 }
 0x767   : > { %2512 = vmatprep.subr.bf16.mxu1 %v2890_v1 }
 0x76a   : > { %2513 = vmatpush3.bf16.msra.mxu1 %v2684_v5 }
 0x76b   : > { %2514 = vmatprep.subr.bf16.mxu1 %v2890_v1 }
 0x76e   : > { %2515 = vmatpush3.bf16.msra.mxu1 %v2685_v6 }
 0x76f   : > { %2546 = vmatprep.subr.bf16.mxu1 %v2890_v1 }
 0x811   : > { %v1199_v38 = vpop.f32.mrf.mxu1 }
 0x812   : > { %v1200_v39 = vadd.f32 %v2305_v37, %v1199_v38  ;;  %v2686_v37 = vld [vmem:[#allocation2 + $0x18] sm:$0xff]   ;;  %v2687_v38 = vld [vmem:[#allocation2 + $0x10] sm:$0xff]  }
 0x813   : > { %v2490_v40 = vpop.f32.mrf.mxu1 }
 0x814   : > { %v3230_v41 = vadd.f32 %v1200_v39, %v3162_v17 }
 0x815   : > { %v1202_v42 = vpop.f32.mrf.mxu1 }
 0x816   : > { %v1208_v43 = vsel %vm811_vm3, %v3230_v41, 0.0 }
 0x817   : > { %1209 = vadd.xlane.f32.xlu0 %v1208_v43  ;;  %v2491_v44 = vpop.f32.mrf.mxu1  ;;  %v2326_v43 = vld [vmem:[%s3414_s29 + $0x1] ss:$0 sm:$0xff] }
 0x8a0   : > { %v1210_v45 = vpop.xlane.xlu0 %1209 }
 0x8a1   : > { %v1211_v46 = vmul.f32 0.03125, %v1210_v45  ;;  %v2327_v45 = vld [vmem:[%s3384_s5 + $0x1] ss:$0 sm:$0xff] }
 0x8a3   : > { %v1212_v47 = vsub.f32 %v3230_v41, %v1211_v46 }
 0x8a5   : > { %v1213_v48 = vmul.f32 %v1212_v47, %v1212_v47 }
 0x8a7   : > { %v1214_v49 = vsel %vm811_vm3, %v1213_v48, 0.0 }
 0x8a8   : > { %1215 = vadd.xlane.f32.xlu1 %v1214_v49  ;;  %v2329_v49 = vld [vmem:[%s3386_s7 + $0x1] ss:$0 sm:$0xff] }
 0x931   : > { %v1216_v17 = vpop.xlane.xlu1 %1215 }
 0x932   : > { %v1217_v53 = vmul.f32 0.03125, %v1216_v17 }
 0x934   : > { %v1218_v54 = vadd.f32 1e-05, %v1217_v53 }
 0x936   : > { %2710 = vrsqrt.f32 %v1218_v54 }
 0x943   : > { %v2711_v55 = vpop.eup %2710 }
 0x944   : > { %v1220_v57 = vmul.f32 %v2711_v55, %v1212_v47 }
 0x946   : > { %v1227_v59 = vmul.f32 %v2309_v56, %v1220_v57 }
 0x948   : > { %v1234_v60 = vadd.f32 %v2310_v58, %v1227_v59 }
 0x94a   : > { %v1235_v61 = vpack.c.bf16 %v1234_v60, %v1234_v60 }
 0x94c   : > { %2497 = vmatmul.mubr.msk.bf16.vlgmr.msra.gmra.mxu0 %vm811_vm3, %v1235_v61 }
 0x94d   : > { %2524 = vmatprep.mubr.msk.bf16.mxu0 %vm2891_vm0, %v2890_v1  ;;  %2521 = vmatpush3.bf16.msra.mxu0 %v2686_v37 }
 0x94e   : > { %2522 = vmatprep.subr.bf16.mxu0 %v2890_v1 }
 0x951   : > { %2523 = vmatpush3.bf16.msra.mxu0 %v2687_v38 }
 0x952   : > { %2528 = vmatprep.subr.bf16.mxu0 %v2890_v1 }
 0xa0c   : > { %v1296_v8 = vpop.f32.mrf.mxu0 }
 0xa0d   : > { %v1297_v9 = vadd.f32 %v2311_v7, %v1296_v8 }
 0xa0e   : > { %v2498_v10 = vpop.f32.mrf.mxu0 }
 0xa0f   : > { %v1303_v11 = vmul.f32 0.044715, %v1297_v9  ;;  %v1302_v20 = vmul.f32 0.5, %v1297_v9 }
 0xa10   : > { %v1299_v12 = vpop.f32.mrf.mxu0 }
 0xa11   : > { %v1304_v13 = vmul.f32 %v1303_v11, %v1297_v9 }
 0xa12   : > { %v2499_v14 = vpop.f32.mrf.mxu0 }
 0xa13   : > { %v1305_v15 = vmul.f32 %v1304_v13, %v1297_v9 }
 0xa15   : > { %v1306_v16 = vadd.f32 %v1305_v15, %v1297_v9 }
 0xa17   : > { %v1307_v18 = vmul.f32 0.7978846, %v1306_v16 }
 0xa19   : > { %2712 = vtanh.f32 %v1307_v18 }
 0xa26   : > { %v2713_v19 = vpop.eup %2712 }
 0xa27   : > { %v1309_v21 = vadd.f32 1.0, %v2713_v19 }
 0xa29   : > { %v1310_v22 = vmul.f32 %v1309_v21, %v1302_v20 }
 0xa2b   : > { %v1311_v23 = vpack.c.bf16 %v1310_v22, %v1310_v22 }
 0xa2d   : > { %2517 = vmatmul.mubr.bf16.vlgmr.msra.gmra.mxu1 %v1311_v23 }
 0xa2e   : > { %2548 = vmatprep.mubr.msk.bf16.mxu1 %vm2891_vm0, %v2890_v1 }
 0xaed   : > { %v1417_v25 = vpop.f32.mrf.mxu1 }
 0xaee   : > { %v1418_v26 = vadd.f32 %v2315_v24, %v1417_v25 }
 0xaef   : > { %v2518_v27 = vpop.f32.mrf.mxu1 }
 0xaf0   : > { %v3264_v28 = vadd.f32 %v1418_v26, %v3230_v41 }
 0xaf1   : > { %v1420_v29 = vpop.f32.mrf.mxu1 }
 0xaf2   : > { %v1428_v30 = vsel %vm811_vm3, %v3264_v28, 0.0 }
 0xaf3   : > { %1429 = vadd.xlane.f32.xlu0 %v1428_v30  ;;  %v2519_v31 = vpop.f32.mrf.mxu1 }
 0xb7c   : > { %v1430_v32 = vpop.xlane.xlu0 %1429 }
 0xb7d   : > { %v1431_v33 = vmul.f32 0.03125, %v1430_v32 }
 0xb7f   : > { %v1432_v34 = vsub.f32 %v3264_v28, %v1431_v33 }
 0xb81   : > { %v1433_v35 = vmul.f32 %v1432_v34, %v1432_v34 }
 0xb83   : > { %v1434_v36 = vsel %vm811_vm3, %v1433_v35, 0.0 }
 0xb84   : > { %1435 = vadd.xlane.f32.xlu0 %v1434_v36 }
 0xc0d   : > { %v1436_v39 = vpop.xlane.xlu0 %1435 }
 0xc0e   : > { %v1437_v40 = vmul.f32 0.03125, %v1436_v39  ;;  %v2688_v39 = vld [vmem:[#allocation4 + $0x18] sm:$0xff]  }
 0xc10   : > { %v1438_v41 = vadd.f32 1e-05, %v1437_v40  ;;  %v2689_v40 = vld [vmem:[#allocation4 + $0x10] sm:$0xff]  }
 0xc12   : > { %2714 = vrsqrt.f32 %v1438_v41 }
 0xc1f   : > { %v2715_v42 = vpop.eup %2714 }
 0xc20   : > { %v1440_v44 = vmul.f32 %v2715_v42, %v1432_v34 }
 0xc22   : > { %v1447_v46 = vmul.f32 %v2326_v43, %v1440_v44 }
 0xc24   : > { %v1454_v47 = vadd.f32 %v2327_v45, %v1447_v46 }
 0xc26   : > { %v1455_v48 = vpack.c.bf16 %v1454_v47, %v1454_v47 }
 0xc28   : > { %2525 = vmatmul.mubr.msk.bf16.vlgmr.msra.gmra.mxu0 %vm811_vm3, %v1455_v48  ;;  %v2338_v48 = vld [vmem:[%s3388_s9 + $0x1] ss:$0 sm:$0xff] }
 0xc29   : > { %2530 = vmatprep.mubr.msk.bf16.mxu0 %vm2891_vm0, %v2890_v1 }
 0xce8   : > { %v1518_v50 = vpop.f32.mrf.mxu0 }
 0xce9   : > { %v1519_v52 = vadd.f32 %v2329_v49, %v1518_v50 }
 0xcea   : > { %v2526_v17 = vpop.f32.mrf.mxu0 }
 0xceb   : > { %v1526_v53 = vpack.c.bf16 %v1519_v52, %v1519_v52  ;;  %v1524_v56 = vmul.f32 0.25, %v1519_v52 }
 0xcec   : > { %v1521_v54 = vpop.f32.mrf.mxu0 }
 0xced   : > { %1528 = vrot.lane.b32.xlu0 %v1526_v53, %s2892_s27  ;;  %v1525_v57 = vpack.c.bf16 %v1524_v56, %v1524_v56  ;;  %s3416_s27 = smov 16  }
 0xcee   : > { %v2527_v55 = vpop.f32.mrf.mxu0 }
 0xcf1   : > { %1639 = vrot.lane.b32.xlu0 %v1526_v53, %s2893_s22 }
 0xcf5   : > { %1637 = vrot.lane.b32.xlu0 %v1525_v57, %s2894_s4 }
 0xd5f   : > { %v1529_v58 = vpop.permute.xlu0 %1528 }
 0xd60   : > { %v1534_v59 = vsel %vm913_vm4, %v1529_v58, 0 }
 0xd61   : > { %2529 = vmatpush3.bf16.xpose.msra.mxu0 %v1534_v59 }
 0xd62   : > { %2534 = vmatprep.subr.bf16.mxu0 %v2890_v1 }
 0xd63   : > { %v1640_v13 = vpop.permute.xlu0 %1639 }
 0xd64   : > { %v1645_v15 = vsel %vm913_vm4, %v1640_v13, 0  ;;  %v2696_v13 = vld [vmem:[#allocation7 + $0x58] sm:$0xff]  }
 0xd67   : > { %v1638_v16 = vpop.permute.xlu0 %1637 }
 0xd68   : > { %2531 = vmatmul.mubr.msk.bf16.vlgmr.msra.gmra.mxu0 %vm913_vm4, %v1525_v57 }
 0xd69   : > { %2536 = vmatprep.mubr.msk.bf16.mxu0 %vm2891_vm0, %v2890_v1 }
 0xe28   : > { %v1570_v60 = vpop.f32.mrf.mxu0 }
 0xe29   : > { %v1571_v61 = vadd.f32 %v1570_v60, %v3199_v51 }
 0xe2a   : > { %v2532_v62 = vpop.f32.mrf.mxu0 }
 0xe2b   : > { %v1576_v63 = vsel %vm960_vm5, %v1571_v61, -inf  ;;  %v2691_v62 = vld [vmem:[#allocation6 + $0x10] sm:$0xff]  }
 0xe2c   : > { %1577 = vmax.xlane.f32.xlu1 %v1576_v63  ;;  %v1573_v0 = vpop.f32.mrf.mxu0 }
 0xe2e   : > { %v2533_v2 = vpop.f32.mrf.mxu0 }
 0xeb5   : > { %v1578_v3 = vpop.xlane.xlu1 %1577 }
 0xeb6   : > { %v1579_v4 = vsub.f32 %v1571_v61, %v1578_v3  ;;  %v2690_v61 = vld [vmem:[#allocation6 + $0x18] sm:$0xff]   ;;  %v2344_v3 = vld [vmem:[%s3389_s10 + $0x1] ss:$0 sm:$0xff] }
 0xeb8   : > { %v1580_v5 = vmul.f32 1.442695, %v1579_v4 }
 0xeba   : > { %2716 = vpow2.f32 %v1580_v5  ;;  %v2345_v5 = vld [vmem:[%s3390_s11 + $0x1] ss:$0 sm:$0xff] }
 0xec7   : > { %v2717_v6 = vpop.eup %2716 }
 0xec8   : > { %v1582_v7 = vsel %vm960_vm5, %v2717_v6, 0.0 }
 0xec9   : > { %1583 = vadd.xlane.f32.xlu1 %v1582_v7 }
 0xeda   : > { %1588 = vrot.lane.b32.xlu1 %v1526_v53, %s2896_s21 }
 0xf52   : > { %v1584_v8 = vpop.xlane.xlu1 %1583 }
 0xf53   : > { %2718 = vrcp.f32 %v1584_v8 }
 0xf56   : > { %v1589_v9 = vpop.permute.xlu1 %1588 }
 0xf57   : > { %v1594_v10 = vsel %vm978_vm6, %v1589_v9, 0  ;;  %v2692_v9 = vld [vmem:[#allocation7 + $0x78] sm:$0xff]  }
 0xf58   : > { %2535 = vmatpush3.bf16.msra.mxu0 %v1594_v10  ;;  %v2693_v10 = vld [vmem:[#allocation7 + $0x70] sm:$0xff]  }
 0xf59   : > { %2540 = vmatprep.subr.bf16.mxu0 %v2890_v1 }
 0xf60   : > { %v2719_v11 = vpop.eup %2718 }
 0xf61   : > { %v1586_v12 = vmul.f32 %v2719_v11, %v2717_v6  ;;  %v2694_v11 = vld [vmem:[#allocation7 + $0x68] sm:$0xff]  }
 0xf63   : > { %v1587_v14 = vpack.c.bf16 %v1586_v12, %v1586_v12  ;;  %v2695_v12 = vld [vmem:[#allocation7 + $0x60] sm:$0xff]  }
 0xf65   : > { %2537 = vmatmul.mubr.msk.bf16.vlgmr.msra.gmra.mxu0 %vm960_vm5, %v1587_v14  ;;  %v2697_v14 = vld [vmem:[#allocation7 + $0x50] sm:$0xff]  }
 0xf66   : > { %2541 = vmatpush3.bf16.xpose.msra.mxu0 %v1645_v15  ;;  %2542 = vmatprep.mubr.msk.bf16.mxu0 %vm2891_vm0, %v2890_v1  ;;  %v2698_v15 = vld [vmem:[#allocation7 + $0x48] sm:$0xff]  }
 0xf67   : > { %2552 = vmatprep.subr.bf16.mxu0 %v2890_v1 }
 0xf6d   : > { %2543 = vmatmul.mubr.msk.bf16.vlgmr.msra.gmra.mxu0 %vm913_vm4, %v1638_v16  ;;  %v2699_v16 = vld [vmem:[#allocation7 + $0x40] sm:$0xff]  }
 0xf6e   : > { %2556 = vmatprep.mubr.msk.bf16.mxu0 %vm2891_vm0, %v2890_v1  ;;  %2553 = vmatpush3.bf16.msra.mxu0 %v2688_v39 }
 0xf6f   : > { %2554 = vmatprep.subr.bf16.mxu0 %v2890_v1 }
 0xf72   : > { %2555 = vmatpush3.bf16.msra.mxu0 %v2689_v40 }
 0xf73   : > { %2568 = vmatprep.subr.bf16.mxu0 %v2890_v1 }
0x1025   : > { %v1630_v18 = vpop.f32.mrf.mxu0 }
0x1027   : > { %v2538_v19 = vpop.f32.mrf.mxu0 }
0x1029   : > { %v1633_v20 = vpop.f32.mrf.mxu0 }
0x102b   : > { %v2539_v21 = vpop.f32.mrf.mxu0 }
0x102d   : > { %v1681_v22 = vpop.f32.mrf.mxu0 }
0x102e   : > { %v1682_v23 = vadd.f32 %v1681_v22, %v3199_v51 }
0x102f   : > { %v2544_v24 = vpop.f32.mrf.mxu0 }
0x1030   : > { %v1687_v25 = vsel %vm960_vm5, %v1682_v23, -inf }
0x1031   : > { %1688 = vmax.xlane.f32.xlu0 %v1687_v25  ;;  %v1684_v26 = vpop.f32.mrf.mxu0 }
0x1033   : > { %v2545_v27 = vpop.f32.mrf.mxu0 }
0x1047   : > { %1699 = vrot.lane.b32.xlu0 %v1526_v53, %s2895_s30 }
0x10ba   : > { %v1689_v29 = vpop.xlane.xlu0 %1688 }
0x10bb   : > { %v1690_v30 = vsub.f32 %v1682_v23, %v1689_v29 }
0x10bd   : > { %v1691_v31 = vmul.f32 1.442695, %v1690_v30 }
0x10be   : > { %v1700_v32 = vpop.permute.xlu0 %1699 }
0x10bf   : > { %2720 = vpow2.f32 %v1691_v31  ;;  %v1705_v33 = vsel %vm978_vm6, %v1700_v32, 0 }
0x10c0   : > { %2547 = vmatpush3.bf16.msra.mxu1 %v1705_v33 }
0x10c1   : > { %2560 = vmatprep.subr.bf16.mxu1 %v2890_v1 }
0x10cc   : > { %v2721_v34 = vpop.eup %2720 }
0x10cd   : > { %v1693_v51 = vsel %vm960_vm5, %v2721_v34, 0.0 }
0x10ce   : > { %1694 = vadd.xlane.f32.xlu1 %v1693_v51  ;;  %v2352_v51 = vld [vmem:[%s3394_s15 + $0x1] ss:$0 sm:$0xff] }
0x1157   : > { %v1695_v35 = vpop.xlane.xlu1 %1694 }
0x1158   : > { %2722 = vrcp.f32 %v1695_v35 }
0x1165   : > { %v2723_v36 = vpop.eup %2722 }
0x1166   : > { %v1697_v37 = vmul.f32 %v2723_v36, %v2721_v34 }
0x1168   : > { %v1698_v38 = vpack.c.bf16 %v1697_v37, %v1697_v37 }
0x116a   : > { %2549 = vmatmul.mubr.msk.bf16.vlgmr.msra.gmra.mxu1 %vm960_vm5, %v1698_v38 }
0x116b   : > { %2564 = vmatprep.mubr.msk.bf16.mxu1 %vm2891_vm0, %v2890_v1  ;;  %2561 = vmatpush3.bf16.msra.mxu1 %v2690_v61 }
0x116c   : > { %2562 = vmatprep.subr.bf16.mxu1 %v2890_v1 }
0x116f   : > { %2563 = vmatpush3.bf16.msra.mxu1 %v2691_v62 }
0x122a   : > { %v1741_v41 = vpop.f32.mrf.mxu1 }
0x122b   : > { %1748 = vrot.lane.b32.xlu1 %v1741_v41, %s3416_s27 }
0x122c   : > { %v2550_v42 = vpop.f32.mrf.mxu1 }
0x122e   : > { %v1744_v43 = vpop.f32.mrf.mxu1 }
0x1230   : > { %v2551_v44 = vpop.f32.mrf.mxu1 }
0x129d   : > { %v1749_v45 = vpop.permute.xlu1 %1748 }
0x129e   : > { %v1751_v46 = vsel %vm913_vm4, %v1630_v18, %v1749_v45  ;;  %v2347_v18 = vld [vmem:[%s3392_s13 + $0x1] ss:$0 sm:$0xff] }
0x129f   : > { %v1752_v47 = vpack.c.bf16 %v1751_v46, %v1751_v46 }
0x12a1   : > { %2557 = vmatmul.mubr.msk.bf16.vlgmr.msra.gmra.mxu0 %vm811_vm3, %v1752_v47  ;;  %v2078_v47 = vld [vmem:[#allocation9 + $0x18] sm:$0xff] }
0x12a2   : > { %2584 = vmatprep.mubr.msk.bf16.mxu0 %vm2891_vm0, %v2890_v1  ;;  %2569 = vmatpush3.bf16.msra.mxu0 %v2692_v9 }
0x12a3   : > { %2570 = vmatprep.subr.bf16.mxu0 %v2890_v1 }
0x12a6   : > { %2571 = vmatpush3.bf16.msra.mxu0 %v2693_v10 }
0x12a7   : > { %2572 = vmatprep.subr.bf16.mxu0 %v2890_v1 }
0x12aa   : > { %2573 = vmatpush3.bf16.msra.mxu0 %v2694_v11 }
0x12ab   : > { %2574 = vmatprep.subr.bf16.mxu0 %v2890_v1 }
0x12ae   : > { %2575 = vmatpush3.bf16.msra.mxu0 %v2695_v12 }
0x12af   : > { %2576 = vmatprep.subr.bf16.mxu0 %v2890_v1 }
0x12b2   : > { %2577 = vmatpush3.bf16.msra.mxu0 %v2696_v13 }
0x12b3   : > { %2578 = vmatprep.subr.bf16.mxu0 %v2890_v1 }
0x12b6   : > { %2579 = vmatpush3.bf16.msra.mxu0 %v2697_v14 }
0x12b7   : > { %2580 = vmatprep.subr.bf16.mxu0 %v2890_v1 }
0x12ba   : > { %2581 = vmatpush3.bf16.msra.mxu0 %v2698_v15 }
0x12bb   : > { %2582 = vmatprep.subr.bf16.mxu0 %v2890_v1 }
0x12be   : > { %2583 = vmatpush3.bf16.msra.mxu0 %v2699_v16 }
0x12bf   : > { %2588 = vmatprep.subr.mxu0 %v2890_v1 }
0x1361   : > { %v1815_v49 = vpop.f32.mrf.mxu0 }
0x1362   : > { %v1816_v50 = vadd.f32 %v2338_v48, %v1815_v49  ;;  %v2077_v48 = vld [vmem:[#allocation9 + $0x10] sm:$0xff]  ;;  %v2076_v49 = vld [vmem:[#allocation9 + $0x8] sm:$0xff] }
0x1363   : > { %v2558_v52 = vpop.f32.mrf.mxu0 }
0x1364   : > { %v3326_v17 = vadd.f32 %v1816_v50, %v3264_v28  ;;  %v2075_v50 = vld [vmem:[#allocation9] sm:$0xff] }
0x1365   : > { %v1818_v53 = vpop.f32.mrf.mxu0 }
0x1366   : > { %v1826_v54 = vsel %vm811_vm3, %v3326_v17, 0.0 }
0x1367   : > { %1827 = vadd.xlane.f32.xlu0 %v1826_v54  ;;  %v2559_v55 = vpop.f32.mrf.mxu0 }
0x1368   : > { %v2361_v55 = vld [vmem:[%s3395_s16] ss:$0 sm:$0xff] }
0x13f0   : > { %v1828_v56 = vpop.xlane.xlu0 %1827 }
0x13f1   : > { %v1829_v57 = vmul.f32 0.03125, %v1828_v56 }
0x13f3   : > { %v1830_v58 = vsub.f32 %v3326_v17, %v1829_v57  ;;  %v2362_v57 = vld [vmem:[%s3396_s17] ss:$0 sm:$0xff] }
0x13f5   : > { %v1831_v59 = vmul.f32 %v1830_v58, %v1830_v58 }
0x13f7   : > { %v1832_v60 = vsel %vm811_vm3, %v1831_v59, 0.0 }
0x13f8   : > { %1833 = vadd.xlane.f32.xlu1 %v1832_v60 }
0x1481   : > { %v1834_v28 = vpop.xlane.xlu1 %1833 }
0x1482   : > { %v1835_v63 = vmul.f32 0.03125, %v1834_v28 }
0x1484   : > { %v1836_v0 = vadd.f32 1e-05, %v1835_v63 }
0x1486   : > { %2724 = vrsqrt.f32 %v1836_v0 }
0x1493   : > { %v2725_v2 = vpop.eup %2724 }
0x1494   : > { %v1838_v4 = vmul.f32 %v2725_v2, %v1830_v58 }
0x1496   : > { %v1845_v6 = vmul.f32 %v2344_v3, %v1838_v4 }
0x1498   : > { %v1852_v7 = vadd.f32 %v2345_v5, %v1845_v6 }
0x149a   : > { %v1853_v8 = vpack.c.bf16 %v1852_v7, %v1852_v7 }
0x149c   : > { %2565 = vmatmul.mubr.msk.bf16.vlgmr.msra.gmra.mxu1 %vm811_vm3, %v1853_v8 }
0x155c   : > { %v1916_v19 = vpop.f32.mrf.mxu1 }
0x155d   : > { %v1917_v20 = vadd.f32 %v2347_v18, %v1916_v19 }
0x155e   : > { %v2566_v21 = vpop.f32.mrf.mxu1 }
0x155f   : > { %v1923_v22 = vmul.f32 0.044715, %v1917_v20  ;;  %v1922_v31 = vmul.f32 0.5, %v1917_v20 }
0x1560   : > { %v1919_v23 = vpop.f32.mrf.mxu1 }
0x1561   : > { %v1924_v24 = vmul.f32 %v1923_v22, %v1917_v20 }
0x1562   : > { %v2567_v25 = vpop.f32.mrf.mxu1 }
0x1563   : > { %v1925_v26 = vmul.f32 %v1924_v24, %v1917_v20 }
0x1565   : > { %v1926_v27 = vadd.f32 %v1925_v26, %v1917_v20 }
0x1567   : > { %v1927_v29 = vmul.f32 0.7978846, %v1926_v27 }
0x1569   : > { %2726 = vtanh.f32 %v1927_v29 }
0x1576   : > { %v2727_v30 = vpop.eup %2726 }
0x1577   : > { %v1929_v32 = vadd.f32 1.0, %v2727_v30 }
0x1579   : > { %v1930_v33 = vmul.f32 %v1929_v32, %v1922_v31 }
0x157b   : > { %v1931_v34 = vpack.c.bf16 %v1930_v33, %v1930_v33 }
0x157d   : > { %2585 = vmatmul.mubr.bf16.vlgmr.msra.gmra.mxu0 %v1931_v34 }
0x157e   : > { %2596 = vmatprep.mubr.msk.f32.mxu0 %vm2891_vm0, %v2890_v1  ;;  %2589 = vmatpush3.msra.mxu0 %v2078_v47 }
0x157f   : > { %2590 = vmatprep.subr.mxu0 %v2890_v1 }
0x1580   : > { %2591 = vmatpush3.msra.mxu0 %v2077_v48 }
0x1581   : > { %2592 = vmatprep.subr.mxu0 %v2890_v1 }
0x1582   : > { %2593 = vmatpush3.msra.mxu0 %v2076_v49 }
0x1583   : > { %2594 = vmatprep.subr.mxu0 %v2890_v1  ;;  %v2363_v1 = vld [vmem:[%s3398_s19] ss:$0 sm:$0xff] }
0x1584   : > { %2595 = vmatpush3.msra.mxu0 %v2075_v50 }
0x163d   : > { %v2039_v35 = vpop.f32.mrf.mxu0 }
0x163e   : > { %v2040_v36 = vadd.f32 %v2352_v51, %v2039_v35 }
0x163f   : > { %v2586_v37 = vpop.f32.mrf.mxu0 }
0x1640   : > { %v2045_v38 = vadd.f32 %v2040_v36, %v3326_v17 }
0x1641   : > { %v2042_v39 = vpop.f32.mrf.mxu0 }
0x1642   : > { %v2048_v40 = vsel %vm811_vm3, %v2045_v38, 0.0 }
0x1643   : > { %2049 = vadd.xlane.f32.xlu0 %v2048_v40  ;;  %v2587_v41 = vpop.f32.mrf.mxu0 }
0x16cc   : > { %v2050_v42 = vpop.xlane.xlu0 %2049 }
0x16cd   : > { %v2051_v43 = vmul.f32 0.03125, %v2050_v42 }
0x16cf   : > { %v2052_v44 = vsub.f32 %v2045_v38, %v2051_v43 }
0x16d1   : > { %v2053_v45 = vmul.f32 %v2052_v44, %v2052_v44 }
0x16d3   : > { %v2054_v46 = vsel %vm811_vm3, %v2053_v45, 0.0 }
0x16d4   : > { %2055 = vadd.xlane.f32.xlu0 %v2054_v46 }
0x175d   : > { %v2056_v52 = vpop.xlane.xlu0 %2055 }
0x175e   : > { %v2057_v17 = vmul.f32 0.03125, %v2056_v52 }
0x1760   : > { %v2058_v53 = vadd.f32 1e-05, %v2057_v17 }
0x1762   : > { %2728 = vrsqrt.f32 %v2058_v53 }
0x176f   : > { %v2729_v54 = vpop.eup %2728 }
0x1770   : > { %v2060_v56 = vmul.f32 %v2729_v54, %v2052_v44 }
0x1772   : > { %v2067_v58 = vmul.f32 %v2361_v55, %v2060_v56 }
0x1774   : > { %v2074_v59 = vadd.f32 %v2362_v57, %v2067_v58 }
0x1776   : > { %2597 = vmatmul.mubr.msk.f32.vlgmr.msra.gmra.mxu0 %vm811_vm3, %v2074_v59 }
0x1836   : > { %v2155_v60 = vpop.f32.mrf.mxu0 }
0x1837   : > { %v2156_v61 = vadd.f32 %v2363_v1, %v2155_v60 }
0x1838   : > { %v2598_v62 = vpop.f32.mrf.mxu0 }
0x1839   : > { %2159 = vst [vmem:[%s714_s0] sm:$0xff] %v2156_v61 }
0x183a PF: > { %s33_s1 = sadd.s32 1, %s2878_s1  }
0x183b   : > { %p30_p2 = scmp.ge.s32.totalorder %s33_s1, 4  }
0x183d   :  { %32 = sbr.rel (!%p30_p2) target bundleno = 9 (0x9), region = 166 }
0x1842   :  { %2179 = vsyncpa [#allocation3], 1 }
0x1843   :  { %2181 = vsyncpa [#allocation3 + $0x1], 1 }
0x1844   :  { %2182 = vsyncpa [#allocation5], 1 }
0x1845   :  { %2183 = vsyncpa [#allocation8], 1 }

</bundles_post_ra>
